<compile_context>
chip_gen: v6e
topology: v6e:2x2x1
jax: 0.10.0
libtpu: 0.0.40
codegen_flags: <defaults>
</compile_context>

<pallas_src>
import functools

import jax
import jax.numpy as jnp
from jax import lax
from jax.experimental import pallas as pl
from jax.experimental.pallas import tpu as pltpu


def _round_up(x, m):
    return (x + m - 1) // m * m


def _fcn_head_kernel(x_ref, w1_ref, shift_ref, w2_ref, b2_ref, out_ref, *, Wp):
    """One whole padded image per grid step, lane-dense (channels, pixels) compute.

    x_ref    : (1, Cin, P_in)   bf16  zero-padded image, flat padded-row-major pixels on lanes
    w1_ref   : (9, Cmid, Cin)   bf16  3x3 conv weights with BN scale folded in, tap = kh*3 + kw
    shift_ref: (Cmid,)          f32   SMEM  folded BN shift (beta - mean * scale)
    w2_ref   : (Cout*Cmid,)     f32   SMEM  1x1 conv weights, row-major [o, c]
    b2_ref   : (Cout,)          f32   SMEM  1x1 conv bias
    out_ref  : (1, Cout, P_out) f32   output in padded-flat pixel order (q = h*Wp + w)
    """
    Cmid = w1_ref.shape[1]
    Cout = out_ref.shape[1]
    n_pix = out_ref.shape[2]

    # ---- 3x3 conv (+ folded BN scale): 9 static shifted slices, f32 accumulation on the MXU ----
    acc = None
    for kh in range(3):
        for kw in range(3):
            tap = x_ref[0, :, pl.ds(kh * Wp + kw, n_pix)]            # (Cin, P_out) bf16
            part = jnp.dot(w1_ref[kh * 3 + kw], tap,
                           preferred_element_type=jnp.float32)       # (Cmid, P_out) f32
            acc = part if acc is None else acc + part

    # ---- BN shift + ReLU: per-channel SMEM scalar broadcast, fully lane-dense ----
    rows = [jnp.maximum(acc[c:c + 1, :] + shift_ref[c], 0.0) for c in range(Cmid)]

    # Dropout(p=0.1): identity in eval mode.
    # TODO(synk): training-mode dropout not implemented.

    # ---- 1x1 conv + bias, unrolled as VPU broadcast-MACs (Cmid/Cout are tiny for this head) ----
    for o in range(Cout):
        v = rows[0] * w2_ref[o * Cmid]
        for c in range(1, Cmid):
            v = v + rows[c] * w2_ref[o * Cmid + c]
        out_ref[0, o:o + 1, :] = (v + b2_ref[o]).astype(out_ref.dtype)


def fcn_head_forward(x_nchw, w1_oihw, bn_gamma, bn_beta, bn_mean, bn_var, w2_oi, b2, eps=1e-5):
    """Runs _FCNHead forward. x_nchw: (N, Cin, H, W) float32. Returns (N, Cout, H, W) float32."""
    N, Cin, H, W = x_nchw.shape
    Cmid = w1_oihw.shape[0]
    Cout = w2_oi.shape[0]
    Wp = W + 2

    # Output pixel axis = padded-flat index q = h*Wp + w, rounded up for lane-dense (128) stores.
    P_out = _round_up(H * Wp, 128)
    # Every tap slice [kh*Wp + kw, kh*Wp + kw + P_out) must stay inside the flat input slab.
    rows_total = -(-(P_out + 2 * Wp + 2) // Wp)        # >= H + 3, so bottom zero-pad >= 1 row
    P_in = rows_total * Wp

    # ---- single pad + bf16 cast pass over the raw input; the flattening reshape is free ----
    x_pad = jnp.pad(x_nchw.astype(jnp.bfloat16),
                    ((0, 0), (0, 0), (1, rows_total - H - 1), (1, 1)))
    x_flat = x_pad.reshape(N, Cin, P_in)

    # ---- fold BN scale into the 3x3 weights (inference form); keep only the additive shift ----
    scale = bn_gamma / jnp.sqrt(bn_var + eps)                              # (Cmid,)
    w1_taps = jnp.transpose(w1_oihw, (2, 3, 0, 1)).reshape(9, Cmid, Cin)   # tap = kh*3 + kw
    w1_taps = (w1_taps * scale[None, :, None]).astype(jnp.bfloat16)
    shift = (bn_beta - bn_mean * scale).astype(jnp.float32)                # (Cmid,)
    w2_flat = jnp.reshape(w2_oi, (Cout, Cmid)).reshape(Cout * Cmid).astype(jnp.float32)
    b2_f = b2.reshape(Cout).astype(jnp.float32)

    # TODO(synk): for very large H*W add a row-block grid axis with halo (manual pl.ANY DMA or
    # pl.Element) and for very large Cin a K-axis split, to respect v7x's 64 MiB VMEM and keep
    # >=4 grid steps per core; the whole-image-resident block is sized for FCN-head feature maps.
    grid = (N,)

    out_flat = pl.pallas_call(
        functools.partial(_fcn_head_kernel, Wp=Wp),
        out_shape=jax.ShapeDtypeStruct((N, Cout, P_out), jnp.float32),
        grid_spec=pltpu.PrefetchScalarGridSpec(
            num_scalar_prefetch=0,
            grid=grid,
            in_specs=[
                pl.BlockSpec((1, Cin, P_in), lambda n: (n, 0, 0)),       # one padded image / step
                pl.BlockSpec((9, Cmid, Cin), lambda n: (0, 0, 0)),       # folded 3x3 weights, resident
                pl.BlockSpec(memory_space=pltpu.MemorySpace.SMEM),       # BN shift
                pl.BlockSpec(memory_space=pltpu.MemorySpace.SMEM),       # 1x1 weights
                pl.BlockSpec(memory_space=pltpu.MemorySpace.SMEM),       # 1x1 bias
            ],
            out_specs=pl.BlockSpec((1, Cout, P_out), lambda n: (n, 0, 0)),
        ),
        compiler_params=pltpu.CompilerParams(
            dimension_semantics=("parallel",),
            vmem_limit_bytes=32 * 1024 * 1024,
        ),
    )(x_flat, w1_taps, shift, w2_flat, b2_f)

    # Already NCHW-ordered: reshape (free) and drop the 2 pad columns per row + the lane tail.
    out = out_flat[:, :, :H * Wp].reshape(N, Cout, H, Wp)[:, :, :, :W]
    return out


def _reference_forward(x_nchw, w1_oihw, bn_gamma, bn_beta, bn_mean, bn_var, w2_oi, b2, eps=1e-5):
    """Pure-JAX f32 reference (NCHW, matches torch inference semantics)."""
    y = lax.conv_general_dilated(
        x_nchw, w1_oihw, window_strides=(1, 1), padding=((1, 1), (1, 1)),
        dimension_numbers=("NCHW", "OIHW", "NCHW"))
    scale = bn_gamma / jnp.sqrt(bn_var + eps)
    shift = bn_beta - bn_mean * scale
    y = y * scale[None, :, None, None] + shift[None, :, None, None]
    y = jnp.maximum(y, 0.0)
    w2_4d = w2_oi[:, :, None, None]
    out = lax.conv_general_dilated(
        y, w2_4d, window_strides=(1, 1), padding=((0, 0), (0, 0)),
        dimension_numbers=("NCHW", "OIHW", "NCHW"))
    return out + b2[None, :, None, None]


if __name__ == "__main__":
    # Small shapes consistent with the module: in_channels=16 -> inter=4, out channels=4.
    N, Cin, H, W = 2, 16, 16, 16
    Cmid = Cin // 4
    Cout = 4

    key = jax.random.PRNGKey(0)
    kx, k1, k2, k3, k4, k5, k6 = jax.random.split(key, 7)

    x = jax.random.normal(kx, (N, Cin, H, W), dtype=jnp.float32)

    # Deterministic synthetic parameters (shapes match the torch module __init__).
    w1 = jax.random.normal(k1, (Cmid, Cin, 3, 3), dtype=jnp.float32) * 0.1   # Conv2d 3x3, bias=False
    bn_gamma = 1.0 + 0.1 * jax.random.normal(k2, (Cmid,), dtype=jnp.float32)
    bn_beta = 0.1 * jax.random.normal(k3, (Cmid,), dtype=jnp.float32)
    bn_mean = 0.05 * jax.random.normal(k4, (Cmid,), dtype=jnp.float32)
    bn_var = jnp.abs(1.0 + 0.1 * jax.random.normal(k5, (Cmid,), dtype=jnp.float32))
    w2 = jax.random.normal(k6, (Cout, Cmid), dtype=jnp.float32) * 0.1        # Conv2d 1x1 weight (O, I)
    b2 = 0.01 * jnp.arange(Cout, dtype=jnp.float32)                          # Conv2d 1x1 bias

    out = fcn_head_forward(x, w1, bn_gamma, bn_beta, bn_mean, bn_var, w2, b2)
    out = jax.block_until_ready(out)

    ref = _reference_forward(x, w1, bn_gamma, bn_beta, bn_mean, bn_var, w2, b2)
    assert out.shape == (N, Cout, H, W)
    # Tolerance loosened vs a pure-f32 path because input / 3x3 weights are bf16 on the MXU.
    assert jnp.allclose(out, ref, atol=5e-2, rtol=5e-2), "mismatch vs reference"

    print("KERNEL_OK")
</pallas_src>

<mosaic_0001>
module attributes {stable_mosaic.version = 11 : i64} {
  func.func @_fcn_head_kernel(%arg0: i32, %arg1: memref<1x16x432xbf16, #tpu.memory_space<vmem>>, %arg2: memref<9x4x16xbf16, #tpu.memory_space<vmem>>, %arg3: memref<4xf32, #tpu.memory_space<smem>>, %arg4: memref<16xf32, #tpu.memory_space<smem>>, %arg5: memref<4xf32, #tpu.memory_space<smem>>, %arg6: memref<1x4x384xf32, #tpu.memory_space<vmem>>) attributes {dimension_semantics = [#tpu.dimension_semantics<parallel>], iteration_bounds = array<i64: 2>, scalar_prefetch = 0 : i64, scratch_operands = 0 : i64, tpu.core_type = #tpu.core_type<tc>, window_params = [{transform_indices = @transform_0, window_bounds = array<i64: 1, 16, 432>}, {pipeline_mode = #tpu.pipeline_mode<synchronous>, transform_indices = @transform_1, window_bounds = array<i64: 9, 4, 16>}, {transform_indices = @transform_2, window_bounds = array<i64: 4>}, {transform_indices = @transform_3, window_bounds = array<i64: 16>}, {transform_indices = @transform_4, window_bounds = array<i64: 4>}, {transform_indices = @transform_5, window_bounds = array<i64: 1, 4, 384>}]} {
    %c0 = arith.constant 0 : index
    %c0_0 = arith.constant 0 : index
    %c0_1 = arith.constant 0 : index
    %0 = vector.load %arg1[%c0, %c0_0, %c0_1] : memref<1x16x432xbf16, #tpu.memory_space<vmem>>, vector<1x16x384xbf16>
    %1 = vector.shape_cast %0 : vector<1x16x384xbf16> to vector<16x384xbf16>
    %c0_2 = arith.constant 0 : index
    %c0_3 = arith.constant 0 : index
    %c0_4 = arith.constant 0 : index
    %2 = vector.load %arg2[%c0_2, %c0_3, %c0_4] : memref<9x4x16xbf16, #tpu.memory_space<vmem>>, vector<1x4x16xbf16>
    %3 = vector.shape_cast %2 : vector<1x4x16xbf16> to vector<4x16xbf16>
    %cst = arith.constant dense<0.000000e+00> : vector<4x384xf32>
    %4 = tpu.matmul %3, %1, %cst {dimension_numbers = #tpu.dot_dimension_numbers<[1], [0], [0], [1], [0, 0, 1, 1], [], []>} : vector<4x16xbf16>, vector<16x384xbf16>, vector<4x384xf32> -> vector<4x384xf32>
    %c0_5 = arith.constant 0 : index
    %c0_6 = arith.constant 0 : index
    %c1 = arith.constant 1 : index
    %5 = vector.load %arg1[%c0_5, %c0_6, %c1] : memref<1x16x432xbf16, #tpu.memory_space<vmem>>, vector<1x16x384xbf16>
    %6 = vector.shape_cast %5 : vector<1x16x384xbf16> to vector<16x384xbf16>
    %c1_7 = arith.constant 1 : index
    %c0_8 = arith.constant 0 : index
    %c0_9 = arith.constant 0 : index
    %7 = vector.load %arg2[%c1_7, %c0_8, %c0_9] : memref<9x4x16xbf16, #tpu.memory_space<vmem>>, vector<1x4x16xbf16>
    %8 = vector.shape_cast %7 : vector<1x4x16xbf16> to vector<4x16xbf16>
    %cst_10 = arith.constant dense<0.000000e+00> : vector<4x384xf32>
    %9 = tpu.matmul %8, %6, %cst_10 {dimension_numbers = #tpu.dot_dimension_numbers<[1], [0], [0], [1], [0, 0, 1, 1], [], []>} : vector<4x16xbf16>, vector<16x384xbf16>, vector<4x384xf32> -> vector<4x384xf32>
    %10 = arith.addf %4, %9 : vector<4x384xf32>
    %c0_11 = arith.constant 0 : index
    %c0_12 = arith.constant 0 : index
    %c2 = arith.constant 2 : index
    %11 = vector.load %arg1[%c0_11, %c0_12, %c2] : memref<1x16x432xbf16, #tpu.memory_space<vmem>>, vector<1x16x384xbf16>
    %12 = vector.shape_cast %11 : vector<1x16x384xbf16> to vector<16x384xbf16>
    %c2_13 = arith.constant 2 : index
    %c0_14 = arith.constant 0 : index
    %c0_15 = arith.constant 0 : index
    %13 = vector.load %arg2[%c2_13, %c0_14, %c0_15] : memref<9x4x16xbf16, #tpu.memory_space<vmem>>, vector<1x4x16xbf16>
    %14 = vector.shape_cast %13 : vector<1x4x16xbf16> to vector<4x16xbf16>
    %cst_16 = arith.constant dense<0.000000e+00> : vector<4x384xf32>
    %15 = tpu.matmul %14, %12, %cst_16 {dimension_numbers = #tpu.dot_dimension_numbers<[1], [0], [0], [1], [0, 0, 1, 1], [], []>} : vector<4x16xbf16>, vector<16x384xbf16>, vector<4x384xf32> -> vector<4x384xf32>
    %16 = arith.addf %10, %15 : vector<4x384xf32>
    %c0_17 = arith.constant 0 : index
    %c0_18 = arith.constant 0 : index
    %c18 = arith.constant 18 : index
    %17 = vector.load %arg1[%c0_17, %c0_18, %c18] : memref<1x16x432xbf16, #tpu.memory_space<vmem>>, vector<1x16x384xbf16>
    %18 = vector.shape_cast %17 : vector<1x16x384xbf16> to vector<16x384xbf16>
    %c3 = arith.constant 3 : index
    %c0_19 = arith.constant 0 : index
    %c0_20 = arith.constant 0 : index
    %19 = vector.load %arg2[%c3, %c0_19, %c0_20] : memref<9x4x16xbf16, #tpu.memory_space<vmem>>, vector<1x4x16xbf16>
    %20 = vector.shape_cast %19 : vector<1x4x16xbf16> to vector<4x16xbf16>
    %cst_21 = arith.constant dense<0.000000e+00> : vector<4x384xf32>
    %21 = tpu.matmul %20, %18, %cst_21 {dimension_numbers = #tpu.dot_dimension_numbers<[1], [0], [0], [1], [0, 0, 1, 1], [], []>} : vector<4x16xbf16>, vector<16x384xbf16>, vector<4x384xf32> -> vector<4x384xf32>
    %22 = arith.addf %16, %21 : vector<4x384xf32>
    %c0_22 = arith.constant 0 : index
    %c0_23 = arith.constant 0 : index
    %c19 = arith.constant 19 : index
    %23 = vector.load %arg1[%c0_22, %c0_23, %c19] : memref<1x16x432xbf16, #tpu.memory_space<vmem>>, vector<1x16x384xbf16>
    %24 = vector.shape_cast %23 : vector<1x16x384xbf16> to vector<16x384xbf16>
    %c4 = arith.constant 4 : index
    %c0_24 = arith.constant 0 : index
    %c0_25 = arith.constant 0 : index
    %25 = vector.load %arg2[%c4, %c0_24, %c0_25] : memref<9x4x16xbf16, #tpu.memory_space<vmem>>, vector<1x4x16xbf16>
    %26 = vector.shape_cast %25 : vector<1x4x16xbf16> to vector<4x16xbf16>
    %cst_26 = arith.constant dense<0.000000e+00> : vector<4x384xf32>
    %27 = tpu.matmul %26, %24, %cst_26 {dimension_numbers = #tpu.dot_dimension_numbers<[1], [0], [0], [1], [0, 0, 1, 1], [], []>} : vector<4x16xbf16>, vector<16x384xbf16>, vector<4x384xf32> -> vector<4x384xf32>
    %28 = arith.addf %22, %27 : vector<4x384xf32>
    %c0_27 = arith.constant 0 : index
    %c0_28 = arith.constant 0 : index
    %c20 = arith.constant 20 : index
    %29 = vector.load %arg1[%c0_27, %c0_28, %c20] : memref<1x16x432xbf16, #tpu.memory_space<vmem>>, vector<1x16x384xbf16>
    %30 = vector.shape_cast %29 : vector<1x16x384xbf16> to vector<16x384xbf16>
    %c5 = arith.constant 5 : index
    %c0_29 = arith.constant 0 : index
    %c0_30 = arith.constant 0 : index
    %31 = vector.load %arg2[%c5, %c0_29, %c0_30] : memref<9x4x16xbf16, #tpu.memory_space<vmem>>, vector<1x4x16xbf16>
    %32 = vector.shape_cast %31 : vector<1x4x16xbf16> to vector<4x16xbf16>
    %cst_31 = arith.constant dense<0.000000e+00> : vector<4x384xf32>
    %33 = tpu.matmul %32, %30, %cst_31 {dimension_numbers = #tpu.dot_dimension_numbers<[1], [0], [0], [1], [0, 0, 1, 1], [], []>} : vector<4x16xbf16>, vector<16x384xbf16>, vector<4x384xf32> -> vector<4x384xf32>
    %34 = arith.addf %28, %33 : vector<4x384xf32>
    %c0_32 = arith.constant 0 : index
    %c0_33 = arith.constant 0 : index
    %c36 = arith.constant 36 : index
    %35 = vector.load %arg1[%c0_32, %c0_33, %c36] : memref<1x16x432xbf16, #tpu.memory_space<vmem>>, vector<1x16x384xbf16>
    %36 = vector.shape_cast %35 : vector<1x16x384xbf16> to vector<16x384xbf16>
    %c6 = arith.constant 6 : index
    %c0_34 = arith.constant 0 : index
    %c0_35 = arith.constant 0 : index
    %37 = vector.load %arg2[%c6, %c0_34, %c0_35] : memref<9x4x16xbf16, #tpu.memory_space<vmem>>, vector<1x4x16xbf16>
    %38 = vector.shape_cast %37 : vector<1x4x16xbf16> to vector<4x16xbf16>
    %cst_36 = arith.constant dense<0.000000e+00> : vector<4x384xf32>
    %39 = tpu.matmul %38, %36, %cst_36 {dimension_numbers = #tpu.dot_dimension_numbers<[1], [0], [0], [1], [0, 0, 1, 1], [], []>} : vector<4x16xbf16>, vector<16x384xbf16>, vector<4x384xf32> -> vector<4x384xf32>
    %40 = arith.addf %34, %39 : vector<4x384xf32>
    %c0_37 = arith.constant 0 : index
    %c0_38 = arith.constant 0 : index
    %c37 = arith.constant 37 : index
    %41 = vector.load %arg1[%c0_37, %c0_38, %c37] : memref<1x16x432xbf16, #tpu.memory_space<vmem>>, vector<1x16x384xbf16>
    %42 = vector.shape_cast %41 : vector<1x16x384xbf16> to vector<16x384xbf16>
    %c7 = arith.constant 7 : index
    %c0_39 = arith.constant 0 : index
    %c0_40 = arith.constant 0 : index
    %43 = vector.load %arg2[%c7, %c0_39, %c0_40] : memref<9x4x16xbf16, #tpu.memory_space<vmem>>, vector<1x4x16xbf16>
    %44 = vector.shape_cast %43 : vector<1x4x16xbf16> to vector<4x16xbf16>
    %cst_41 = arith.constant dense<0.000000e+00> : vector<4x384xf32>
    %45 = tpu.matmul %44, %42, %cst_41 {dimension_numbers = #tpu.dot_dimension_numbers<[1], [0], [0], [1], [0, 0, 1, 1], [], []>} : vector<4x16xbf16>, vector<16x384xbf16>, vector<4x384xf32> -> vector<4x384xf32>
    %46 = arith.addf %40, %45 : vector<4x384xf32>
    %c0_42 = arith.constant 0 : index
    %c0_43 = arith.constant 0 : index
    %c38 = arith.constant 38 : index
    %47 = vector.load %arg1[%c0_42, %c0_43, %c38] : memref<1x16x432xbf16, #tpu.memory_space<vmem>>, vector<1x16x384xbf16>
    %48 = vector.shape_cast %47 : vector<1x16x384xbf16> to vector<16x384xbf16>
    %c8 = arith.constant 8 : index
    %c0_44 = arith.constant 0 : index
    %c0_45 = arith.constant 0 : index
    %49 = vector.load %arg2[%c8, %c0_44, %c0_45] : memref<9x4x16xbf16, #tpu.memory_space<vmem>>, vector<1x4x16xbf16>
    %50 = vector.shape_cast %49 : vector<1x4x16xbf16> to vector<4x16xbf16>
    %cst_46 = arith.constant dense<0.000000e+00> : vector<4x384xf32>
    %51 = tpu.matmul %50, %48, %cst_46 {dimension_numbers = #tpu.dot_dimension_numbers<[1], [0], [0], [1], [0, 0, 1, 1], [], []>} : vector<4x16xbf16>, vector<16x384xbf16>, vector<4x384xf32> -> vector<4x384xf32>
    %52 = arith.addf %46, %51 : vector<4x384xf32>
    %53 = vector.extract_strided_slice %52 {offsets = [0, 0], sizes = [1, 384], strides = [1, 1]} : vector<4x384xf32> to vector<1x384xf32>
    %c0_47 = arith.constant 0 : index
    %54 = memref.load %arg3[%c0_47] : memref<4xf32, #tpu.memory_space<smem>>
    %55 = vector.broadcast %54 : f32 to vector<1x384xf32>
    %56 = arith.addf %53, %55 : vector<1x384xf32>
    %cst_48 = arith.constant 0.000000e+00 : f32
    %57 = vector.broadcast %cst_48 : f32 to vector<1x384xf32>
    %58 = arith.maximumf %56, %57 : vector<1x384xf32>
    %59 = vector.extract_strided_slice %52 {offsets = [1, 0], sizes = [1, 384], strides = [1, 1]} : vector<4x384xf32> to vector<1x384xf32>
    %c1_49 = arith.constant 1 : index
    %60 = memref.load %arg3[%c1_49] : memref<4xf32, #tpu.memory_space<smem>>
    %61 = vector.broadcast %60 : f32 to vector<1x384xf32>
    %62 = arith.addf %59, %61 : vector<1x384xf32>
    %cst_50 = arith.constant 0.000000e+00 : f32
    %63 = vector.broadcast %cst_50 : f32 to vector<1x384xf32>
    %64 = arith.maximumf %62, %63 : vector<1x384xf32>
    %65 = vector.extract_strided_slice %52 {offsets = [2, 0], sizes = [1, 384], strides = [1, 1]} : vector<4x384xf32> to vector<1x384xf32>
    %c2_51 = arith.constant 2 : index
    %66 = memref.load %arg3[%c2_51] : memref<4xf32, #tpu.memory_space<smem>>
    %67 = vector.broadcast %66 : f32 to vector<1x384xf32>
    %68 = arith.addf %65, %67 : vector<1x384xf32>
    %cst_52 = arith.constant 0.000000e+00 : f32
    %69 = vector.broadcast %cst_52 : f32 to vector<1x384xf32>
    %70 = arith.maximumf %68, %69 : vector<1x384xf32>
    %71 = vector.extract_strided_slice %52 {offsets = [3, 0], sizes = [1, 384], strides = [1, 1]} : vector<4x384xf32> to vector<1x384xf32>
    %c3_53 = arith.constant 3 : index
    %72 = memref.load %arg3[%c3_53] : memref<4xf32, #tpu.memory_space<smem>>
    %73 = vector.broadcast %72 : f32 to vector<1x384xf32>
    %74 = arith.addf %71, %73 : vector<1x384xf32>
    %cst_54 = arith.constant 0.000000e+00 : f32
    %75 = vector.broadcast %cst_54 : f32 to vector<1x384xf32>
    %76 = arith.maximumf %74, %75 : vector<1x384xf32>
    %c0_55 = arith.constant 0 : index
    %77 = memref.load %arg4[%c0_55] : memref<16xf32, #tpu.memory_space<smem>>
    %78 = vector.broadcast %77 : f32 to vector<1x384xf32>
    %79 = arith.mulf %58, %78 : vector<1x384xf32>
    %c1_56 = arith.constant 1 : index
    %80 = memref.load %arg4[%c1_56] : memref<16xf32, #tpu.memory_space<smem>>
    %81 = vector.broadcast %80 : f32 to vector<1x384xf32>
    %82 = arith.mulf %64, %81 : vector<1x384xf32>
    %83 = arith.addf %79, %82 : vector<1x384xf32>
    %c2_57 = arith.constant 2 : index
    %84 = memref.load %arg4[%c2_57] : memref<16xf32, #tpu.memory_space<smem>>
    %85 = vector.broadcast %84 : f32 to vector<1x384xf32>
    %86 = arith.mulf %70, %85 : vector<1x384xf32>
    %87 = arith.addf %83, %86 : vector<1x384xf32>
    %c3_58 = arith.constant 3 : index
    %88 = memref.load %arg4[%c3_58] : memref<16xf32, #tpu.memory_space<smem>>
    %89 = vector.broadcast %88 : f32 to vector<1x384xf32>
    %90 = arith.mulf %76, %89 : vector<1x384xf32>
    %91 = arith.addf %87, %90 : vector<1x384xf32>
    %c0_59 = arith.constant 0 : index
    %92 = memref.load %arg5[%c0_59] : memref<4xf32, #tpu.memory_space<smem>>
    %93 = vector.broadcast %92 : f32 to vector<1x384xf32>
    %94 = arith.addf %91, %93 : vector<1x384xf32>
    %c0_60 = arith.constant 0 : index
    %c0_61 = arith.constant 0 : index
    %c0_62 = arith.constant 0 : index
    %95 = vector.load %arg6[%c0_60, %c0_61, %c0_62] : memref<1x4x384xf32, #tpu.memory_space<vmem>>, vector<1x1x384xf32>
    %96 = vector.shape_cast %95 : vector<1x1x384xf32> to vector<1x384xf32>
    %97 = vector.shape_cast %94 : vector<1x384xf32> to vector<1x1x384xf32>
    tpu.vector_store %arg6[%c0_60, %c0_61, %c0_62], %97 {strides = array<i32>} : memref<1x4x384xf32, #tpu.memory_space<vmem>>, vector<1x1x384xf32>,
    %c4_63 = arith.constant 4 : index
    %98 = memref.load %arg4[%c4_63] : memref<16xf32, #tpu.memory_space<smem>>
    %99 = vector.broadcast %98 : f32 to vector<1x384xf32>
    %100 = arith.mulf %58, %99 : vector<1x384xf32>
    %c5_64 = arith.constant 5 : index
    %101 = memref.load %arg4[%c5_64] : memref<16xf32, #tpu.memory_space<smem>>
    %102 = vector.broadcast %101 : f32 to vector<1x384xf32>
    %103 = arith.mulf %64, %102 : vector<1x384xf32>
    %104 = arith.addf %100, %103 : vector<1x384xf32>
    %c6_65 = arith.constant 6 : index
    %105 = memref.load %arg4[%c6_65] : memref<16xf32, #tpu.memory_space<smem>>
    %106 = vector.broadcast %105 : f32 to vector<1x384xf32>
    %107 = arith.mulf %70, %106 : vector<1x384xf32>
    %108 = arith.addf %104, %107 : vector<1x384xf32>
    %c7_66 = arith.constant 7 : index
    %109 = memref.load %arg4[%c7_66] : memref<16xf32, #tpu.memory_space<smem>>
    %110 = vector.broadcast %109 : f32 to vector<1x384xf32>
    %111 = arith.mulf %76, %110 : vector<1x384xf32>
    %112 = arith.addf %108, %111 : vector<1x384xf32>
    %c1_67 = arith.constant 1 : index
    %113 = memref.load %arg5[%c1_67] : memref<4xf32, #tpu.memory_space<smem>>
    %114 = vector.broadcast %113 : f32 to vector<1x384xf32>
    %115 = arith.addf %112, %114 : vector<1x384xf32>
    %c0_68 = arith.constant 0 : index
    %c1_69 = arith.constant 1 : index
    %c0_70 = arith.constant 0 : index
    %116 = vector.load %arg6[%c0_68, %c1_69, %c0_70] : memref<1x4x384xf32, #tpu.memory_space<vmem>>, vector<1x1x384xf32>
    %117 = vector.shape_cast %116 : vector<1x1x384xf32> to vector<1x384xf32>
    %118 = vector.shape_cast %115 : vector<1x384xf32> to vector<1x1x384xf32>
    tpu.vector_store %arg6[%c0_68, %c1_69, %c0_70], %118 {strides = array<i32>} : memref<1x4x384xf32, #tpu.memory_space<vmem>>, vector<1x1x384xf32>,
    %c8_71 = arith.constant 8 : index
    %119 = memref.load %arg4[%c8_71] : memref<16xf32, #tpu.memory_space<smem>>
    %120 = vector.broadcast %119 : f32 to vector<1x384xf32>
    %121 = arith.mulf %58, %120 : vector<1x384xf32>
    %c9 = arith.constant 9 : index
    %122 = memref.load %arg4[%c9] : memref<16xf32, #tpu.memory_space<smem>>
    %123 = vector.broadcast %122 : f32 to vector<1x384xf32>
    %124 = arith.mulf %64, %123 : vector<1x384xf32>
    %125 = arith.addf %121, %124 : vector<1x384xf32>
    %c10 = arith.constant 10 : index
    %126 = memref.load %arg4[%c10] : memref<16xf32, #tpu.memory_space<smem>>
    %127 = vector.broadcast %126 : f32 to vector<1x384xf32>
    %128 = arith.mulf %70, %127 : vector<1x384xf32>
    %129 = arith.addf %125, %128 : vector<1x384xf32>
    %c11 = arith.constant 11 : index
    %130 = memref.load %arg4[%c11] : memref<16xf32, #tpu.memory_space<smem>>
    %131 = vector.broadcast %130 : f32 to vector<1x384xf32>
    %132 = arith.mulf %76, %131 : vector<1x384xf32>
    %133 = arith.addf %129, %132 : vector<1x384xf32>
    %c2_72 = arith.constant 2 : index
    %134 = memref.load %arg5[%c2_72] : memref<4xf32, #tpu.memory_space<smem>>
    %135 = vector.broadcast %134 : f32 to vector<1x384xf32>
    %136 = arith.addf %133, %135 : vector<1x384xf32>
    %c0_73 = arith.constant 0 : index
    %c2_74 = arith.constant 2 : index
    %c0_75 = arith.constant 0 : index
    %137 = vector.load %arg6[%c0_73, %c2_74, %c0_75] : memref<1x4x384xf32, #tpu.memory_space<vmem>>, vector<1x1x384xf32>
    %138 = vector.shape_cast %137 : vector<1x1x384xf32> to vector<1x384xf32>
    %139 = vector.shape_cast %136 : vector<1x384xf32> to vector<1x1x384xf32>
    tpu.vector_store %arg6[%c0_73, %c2_74, %c0_75], %139 {strides = array<i32>} : memref<1x4x384xf32, #tpu.memory_space<vmem>>, vector<1x1x384xf32>,
    %c12 = arith.constant 12 : index
    %140 = memref.load %arg4[%c12] : memref<16xf32, #tpu.memory_space<smem>>
    %141 = vector.broadcast %140 : f32 to vector<1x384xf32>
    %142 = arith.mulf %58, %141 : vector<1x384xf32>
    %c13 = arith.constant 13 : index
    %143 = memref.load %arg4[%c13] : memref<16xf32, #tpu.memory_space<smem>>
    %144 = vector.broadcast %143 : f32 to vector<1x384xf32>
    %145 = arith.mulf %64, %144 : vector<1x384xf32>
    %146 = arith.addf %142, %145 : vector<1x384xf32>
    %c14 = arith.constant 14 : index
    %147 = memref.load %arg4[%c14] : memref<16xf32, #tpu.memory_space<smem>>
    %148 = vector.broadcast %147 : f32 to vector<1x384xf32>
    %149 = arith.mulf %70, %148 : vector<1x384xf32>
    %150 = arith.addf %146, %149 : vector<1x384xf32>
    %c15 = arith.constant 15 : index
    %151 = memref.load %arg4[%c15] : memref<16xf32, #tpu.memory_space<smem>>
    %152 = vector.broadcast %151 : f32 to vector<1x384xf32>
    %153 = arith.mulf %76, %152 : vector<1x384xf32>
    %154 = arith.addf %150, %153 : vector<1x384xf32>
    %c3_76 = arith.constant 3 : index
    %155 = memref.load %arg5[%c3_76] : memref<4xf32, #tpu.memory_space<smem>>
    %156 = vector.broadcast %155 : f32 to vector<1x384xf32>
    %157 = arith.addf %154, %156 : vector<1x384xf32>
    %c0_77 = arith.constant 0 : index
    %c3_78 = arith.constant 3 : index
    %c0_79 = arith.constant 0 : index
    %158 = vector.load %arg6[%c0_77, %c3_78, %c0_79] : memref<1x4x384xf32, #tpu.memory_space<vmem>>, vector<1x1x384xf32>
    %159 = vector.shape_cast %158 : vector<1x1x384xf32> to vector<1x384xf32>
    %160 = vector.shape_cast %157 : vector<1x384xf32> to vector<1x1x384xf32>
    tpu.vector_store %arg6[%c0_77, %c3_78, %c0_79], %160 {strides = array<i32>} : memref<1x4x384xf32, #tpu.memory_space<vmem>>, vector<1x1x384xf32>,
    return
  }
  func.func @transform_0(%arg0: i32) -> (i32, i32, i32) {
    %c0_i32 = arith.constant 0 : i32
    %c0_i32_0 = arith.constant 0 : i32
    %c0_i32_1 = arith.constant 0 : i32
    return %arg0, %c0_i32, %c0_i32_0 : i32, i32, i32
  }
  func.func @transform_1(%arg0: i32) -> (i32, i32, i32) {
    %c0_i32 = arith.constant 0 : i32
    %c0_i32_0 = arith.constant 0 : i32
    %c0_i32_1 = arith.constant 0 : i32
    %c0_i32_2 = arith.constant 0 : i32
    return %c0_i32, %c0_i32_0, %c0_i32_1 : i32, i32, i32
  }
  func.func @transform_2(%arg0: i32) -> i32 {
    %c0_i32 = arith.constant 0 : i32
    %c0_i32_0 = arith.constant 0 : i32
    return %c0_i32 : i32
  }
  func.func @transform_3(%arg0: i32) -> i32 {
    %c0_i32 = arith.constant 0 : i32
    %c0_i32_0 = arith.constant 0 : i32
    return %c0_i32 : i32
  }
  func.func @transform_4(%arg0: i32) -> i32 {
    %c0_i32 = arith.constant 0 : i32
    %c0_i32_0 = arith.constant 0 : i32
    return %c0_i32 : i32
  }
  func.func @transform_5(%arg0: i32) -> (i32, i32, i32) {
    %c0_i32 = arith.constant 0 : i32
    %c0_i32_0 = arith.constant 0 : i32
    %c0_i32_1 = arith.constant 0 : i32
    return %arg0, %c0_i32, %c0_i32_0 : i32, i32, i32
  }
}

</mosaic_0001>

<bundles_post_ra>
// kernel: tpu_custom_call.1
= control target key start
LH: loop header
LB: loop body
LE: loop exit
PB: predicated region body
PF: predicated region fallthrough
CT: control target
= control target key end

     0   :  { %s2826_s0 = inlined_call_operand.hbm [shape: bf16[2,16,432], index: 0, kind: input, shape index: {}]   ;;  %s2827_s1 = inlined_call_operand.hbm [shape: bf16[9,4,16], index: 1, kind: input, shape index: {}]   ;;  %s2828_s2 = inlined_call_operand.vmem [shape: f32[4], index: 2, kind: input, shape index: {}]   ;;  %s2829_s3 = inlined_call_operand.vmem [shape: f32[16], index: 3, kind: input, shape index: {}]   ;;  %s2830_s4 = inlined_call_operand.vmem [shape: f32[4], index: 4, kind: input, shape index: {}]   ;;  %s2831_s5 = inlined_call_operand.hbm [shape: f32[2,4,384], index: 5, kind: output, shape index: {}]  }
   0x1   :  { %2837 = sst [smem:[#allocation20_spill]] %s2826_s0 }
   0x2   :  { %2838 = sst [smem:[#allocation21_spill]] %s2827_s1 }
   0x3   :  { %2839 = sst [smem:[#allocation22_spill]] %s2828_s2 }
   0x4   :  { %2840 = sst [smem:[#allocation23_spill]] %s2829_s3 }
   0x5   :  { %2841 = sst [smem:[#allocation24_spill]] %s2830_s4 }
   0x6   :  { %10 = vsyncpa [#allocation3], 0 }
   0x7   :  { %12 = vsyncpa [#allocation3 + $0x1], 0 }
   0x8   :  { %13 = vsyncpa [#allocation7], 0 }
   0x9   :  { %14 = vsyncpa [#allocation5], 0 }
   0xa   :  { %15 = vsyncpa [#allocation10], 0 }
   0xb   :  { %16 = vsyncpa [#allocation4], 0 }
   0xc   :  { %18 = vsyncpa [#allocation4 + $0x1], 0  ;;  %s2244_s18 = smov 0   ;;  %s2246_s19 = smov 0  }
   0xd   :  { %s2248_s20 = smov 0   ;;  %s2250_s21 = smov 0  }
   0xe LB: > { %2842 = sst [smem:[#allocation18_spill]] %s2186_s20  ;;  %s2265_s22 = sadd.s32 4294967295, %s2190_s21   ;;  %s2190_s21 = sphi %s2250_s21, %s2873_s21   ;;  %s2186_s20 = sphi %s2248_s20, %s2870_s20   ;;  %s2182_s19 = sphi %s2246_s19, %s2872_s19   ;;  %s2178_s18 = sphi %s2244_s18, %s2871_s18  }
   0xf   : > { %s1764_s23 = sadd.s32 4294967294, %s2190_s21   ;;  %p44_p0 = scmp.ne.s32.totalorder %s2182_s19, %s2178_s18 }
  0x10   : > { %p2832_p1 = scmp.eq.s32.totalorder %s2265_s22, 0  ;;  %p158_p3 = scmp.eq.s32.totalorder %s1764_s23, 1 }
  0x11   : > { %p1765_p5 = scmp.ge.s32.totalorder %s2190_s21, 1  ;;  %p165_p7 = scmp.lt.s32.totalorder %s2190_s21, 3 }
  0x12   : > { %p2274_p4 = por %p2832_p1, %p44_p0  ;;  %p2279_p6 = por %p158_p3, %p44_p0 }
  0x13   : > { %s2845_s3 = sld [smem:[#allocation23_spill]]  ;;  %p2287_p8 = pnand %p1765_p5, %p165_p7 }
  0x14   : > { %s2843_s24 = scalar_select %p2274_p4, 1, 0 }
  0x15   : > { %s2844_s25 = scalar_select %p2279_p6, 1, 0 }
  0x16   : > { %s2846_s29 = scalar_select %p2287_p8, 1, 0 }
  0x17   : > { %p1925_p10 = pneg %p2287_p8  ;;  %s2192_s30 = smov [#allocation6]  }
  0x18   : > { %s177_s6 = sshll.u32 %s2192_s30, 4  ;;  %s2848_s2 = sld [smem:[#allocation22_spill]]  ;;  %s2300_s6 = int_to_ptr.vmem [resolvable:$true] %s177_s6 }
  0x19   : > { %s202_s28 = sshll.u32 %s2845_s3, 4  ;;  %p2296_p11 = pnand %p1925_p10, %p2832_p1  ;;  %s203_s28 = int_to_ptr.vmem [resolvable:$true] %s202_s28 }
  0x1a   : > { %s2015_s11 = scalar_lea.vmem %s203_s28, 16  ;;  %p2023_p5 = scmp.lt.s32.totalorder %s203_s28, %s203_s28 }
  0x1b   : > { %p2016_p12 = scmp.ne.s32.totalorder %s203_s28, %s2015_s11  ;;  %p2017_p13 = pneg %p2296_p11 }
  0x1c   : > { %p2024_p7 = scmp.lt.s32.totalorder %s2015_s11, %s2015_s11 }
  0x1d   : > { %p2018_p0 = pnand %p2017_p13, %p2016_p12 }
  0x1e   : > { %s191_s10 = sshll.u32 %s2848_s2, 4  ;;  %p2025_p10 = por %p2024_p7, %p2023_p5  ;;  %s2305_s10 = int_to_ptr.vmem [resolvable:$true] %s191_s10 }
  0x1f   : > { %p2019_p3 = pneg %p2018_p0 }
  0x21   : > { %p2026_p9 = pnand %p2025_p10, %p2019_p3 }
  0x23   : > { %2029 = shalt.err (!%p2026_p9)
}
  0x24   : > { %s2193_s12 = smov [#allocation9]   ;;  %s2041_s13 = scalar_lea.vmem %s2300_s6, 288 }
  0x25   : > { %1934 = dma.vmem_to_smem (!%p2296_p11), %s203_s28, 16, %s2193_s12, [#allocation10]  }
  0x26   : > { %p2042_p1 = scmp.ne.s32.totalorder %s2300_s6, %s2041_s13  ;;  %p2049_p0 = scmp.lt.s32.totalorder %s2300_s6, %s2300_s6 }
  0x27   : > { %p2050_p6 = scmp.lt.s32.totalorder %s2041_s13, %s2041_s13 }
  0x28   : > { %p2044_p2 = pnand %p2042_p1, %p2017_p13 }
  0x29   : > { %p2051_p5 = por %p2050_p6, %p2049_p0 }
  0x2a   : > { %p2045_p12 = pneg %p2044_p2 }
  0x2c   : > { %p2052_p3 = pnand %p2051_p5, %p2045_p12 }
  0x2e   : > { %2055 = shalt.err (!%p2052_p3)
}
  0x2f   : > { %s2194_s14 = smov 32   ;;  %s2195_s15 = smov 2  }
  0x30   : > { %s2849_s1 = sld [smem:[#allocation21_spill]]  ;;  %s2056_s28 = scalar_lea.vmem %s2305_s10, 16 }
  0x31   : > { %s2850_s4 = sld [smem:[#allocation24_spill]]  ;;  %p2057_p1 = scmp.ne.s32.totalorder %s2305_s10, %s2056_s28 }
  0x32   : > { %p2064_p9 = scmp.lt.s32.totalorder %s2305_s10, %s2305_s10  ;;  %p2065_p7 = scmp.lt.s32.totalorder %s2056_s28, %s2056_s28 }
  0x33   : > { %p2059_p2 = pnand %p2057_p1, %p2017_p13 }
  0x34   : > { %p2066_p10 = por %p2065_p7, %p2064_p9 }
  0x35   : > { %p2060_p6 = pneg %p2059_p2 }
  0x36   : > { %1928 = dma.hbm_to_vmem [thread:$0]  (!%p2296_p11), %s2849_s1, 288, %s2300_s6, [#allocation7], %s2194_s14, %s2194_s14, %s2195_s15  }
  0x37   : > { %s213_s27 = sshll.u32 %s2850_s4, 4  ;;  %p2067_p12 = pnand %p2066_p10, %p2060_p6  ;;  %s214_s27 = int_to_ptr.vmem [resolvable:$true] %s213_s27 }
  0x39   : > { %2070 = shalt.err (!%p2067_p12)
}
  0x3a   : > { %s2196_s30 = smov [#allocation8]   ;;  %s2071_s6 = scalar_lea.vmem %s214_s27, 16 }
  0x3b   : > { %1931 = dma.vmem_to_smem (!%p2296_p11), %s2305_s10, 16, %s2196_s30, [#allocation5]  }
  0x3c   : > { %p2072_p0 = scmp.ne.s32.totalorder %s214_s27, %s2071_s6  ;;  %p2079_p1 = scmp.lt.s32.totalorder %s214_s27, %s214_s27 }
  0x3d   : > { %p2080_p2 = scmp.lt.s32.totalorder %s2071_s6, %s2071_s6 }
  0x3e   : > { %p2074_p5 = pnand %p2072_p0, %p2017_p13 }
  0x3f   : > { %p2081_p4 = por %p2080_p2, %p2079_p1 }
  0x40   : > { %p2075_p3 = pneg %p2074_p5 }
  0x42   : > { %p2082_p8 = pnand %p2081_p4, %p2075_p3 }
  0x44   : > { %2085 = shalt.err (!%p2082_p8)
}
  0x45   : > { %s2197_s8 = smov [#allocation11]   ;;  %s2346_s9 = sadd.s32 1, %s2190_s21  }
  0x46   : > { %1937 = dma.vmem_to_smem (!%p2296_p11), %s214_s27, 16, %s2197_s8, [#allocation10]  }
  0x47   : > { %s28_s10 = ssub.s32 %s2190_s21, %s2346_s9  ;;  %s31_s11 = sadd.s32 1, %s2186_s20 }
  0x48   : > { %p29_p4 = scmp.eq.s32.totalorder %s28_s10, 0  ;;  %p38_p8 = scmp.ne.s32.totalorder %s2186_s20, %s2182_s19 }
  0x49   : > { %p39_p13 = scmp.eq.s32.totalorder %s2190_s21, 0  ;;  %p2852_p9 = scmp.eq.s32.totalorder %s2265_s22, 1 }
  0x4a   : > { %s2355_s7 = scalar_select %p29_p4, %s2186_s20, %s31_s11  }
  0x4b   : > { %p40_p6 = por %p39_p13, %p38_p8  ;;  %p2359_p7 = por %p2852_p9, %p38_p8 }
  0x4c   : > { %2851 = sst [smem:[#allocation19_spill]] %s2355_s7  ;;  %p1950_p10 = scmp.lt.s32.totalorder %s2190_s21, 2 }
  0x4d   : > { %s2853_s12 = scalar_select %p2359_p7, 1, 0 }
  0x4e   : > { %s224_s13 = sand.u32 1, %s2186_s20   ;;  %s1830_s15 = sshll.u32 %s2190_s21, 9 }
  0x4f   : > { %s1771_s14 = sshll.u32 %s224_s13, 5  ;;  %s2854_s0 = sld [smem:[#allocation20_spill]] }
  0x50   : > { %s228_s26 = scalar_lea.vmem [#allocation2], %s1771_s14  ;;  %p2373_p11 = pnand %p1950_p10, %p40_p6 }
  0x51   : > { %s235_s27 = sshll.u32 %s228_s26, 4  ;;  %s2377_s30 = scalar_lea.sflag [#allocation3], %s224_s13  ;;  %s2371_s27 = int_to_ptr.vmem [resolvable:$true] %s235_s27 }
  0x52   : > { %p2088_p0 = pneg %p2373_p11 }
  0x55   : > { %s2369_s23 = scalar_lea.hbm %s2854_s0, %s1830_s15  ;;  %s2091_s11 = scalar_lea.hbm %s2854_s0, 1024 }
  0x56   : > { %s2086_s6 = scalar_lea.hbm %s2369_s23, 512  ;;  %p2092_p1 = scmp.lt.s32.totalorder %s2369_s23, %s2854_s0 }
  0x57   : > { %p2087_p12 = scmp.ne.s32.totalorder %s2369_s23, %s2086_s6  ;;  %p2093_p2 = scmp.lt.s32.totalorder %s2091_s11, %s2086_s6 }
  0x59   : > { %p2089_p5 = pnand %p2088_p0, %p2087_p12  ;;  %p2094_p4 = por %p2093_p2, %p2092_p1 }
  0x5b   : > { %p2090_p3 = pneg %p2089_p5 }
  0x5d   : > { %p2095_p8 = pnand %p2094_p4, %p2090_p3 }
  0x5f   : > { %2098 = shalt.err (!%p2095_p8)
}
  0x60   : > { %s2099_s13 = scalar_lea.vmem %s2371_s27, 512  ;;  %s2198_s16 = smov [#allocation2]  }
  0x61   : > { %p2100_p13 = scmp.ne.s32.totalorder %s2371_s27, %s2099_s13  ;;  %s2104_s17 = sshll.u32 %s2198_s16, 4  ;;  %s2105_s17 = int_to_ptr.vmem [resolvable:$false] %s2104_s17 }
  0x62   : > { %s2106_s26 = scalar_lea.vmem %s2105_s17, 1024  ;;  %p2107_p10 = scmp.lt.s32.totalorder %s2371_s27, %s2105_s17 }
  0x63   : > { %p2102_p6 = pnand %p2100_p13, %p2088_p0  ;;  %p2108_p12 = scmp.lt.s32.totalorder %s2106_s26, %s2099_s13 }
  0x65   : > { %p2103_p9 = pneg %p2102_p6  ;;  %p2109_p5 = por %p2108_p12, %p2107_p10 }
  0x67   : > { %p2110_p7 = pnand %p2109_p5, %p2103_p9 }
  0x69   : > { %2113 = shalt.err (!%p2110_p7)
}
  0x6a   : > { %s2199_s6 = smov 256   ;;  %s2200_s8 = smov 16  }
  0x6b   : > { %1941 = dma.hbm_to_vmem [thread:$0]  (!%p2373_p11), %s2369_s23, 512, %s2371_s27, %s2377_s30, %s2199_s6, %s2199_s6, %s2200_s8  }
  0x6c   : > { %p2856_p0 = scmp.ne.s32.totalorder %s2846_s29, 0 }
  0x6d   : > { %s2401_s10 = sand.u32 (!%p2856_p0), 1, %s2182_s19   ;;  %p2857_p7 = scmp.ne.s32.totalorder (!%p2856_p0), %s2843_s24, 0 }
  0x6e   : > { %247 = sbr.rel (%p2856_p0) target bundleno = 577 (0x241), region = 40  ;;  %s1775_s11 = sshll.u32 (!%p2856_p0), %s2401_s10, 5 }
  0x6f   : > { %s250_s14 = scalar_lea.sflag (!%p2856_p0), [#allocation3], %s2401_s10  ;;  %s2405_s15 = scalar_lea.vmem (!%p2856_p0), [#allocation2], %s1775_s11 }
  0x73   : > { %2157 = dma.done.wait (%p2857_p7), %s250_s14, 512  }
  0x74   : > { %2159 = vsyncadd (%p2857_p7), %s250_s14, 4294966784  ;;  %p2858_p11 = scmp.eq.s32.totalorder %s2265_s22, 0 }
  0x76   : > { %2161 = dma.done.wait (%p2858_p11), [#allocation7], 288   ;;  %p2859_p3 = pmov %p2858_p11 }
  0x78   : > { %2163 = vsyncadd (%p2859_p3), [#allocation7], 4294967008  ;;  %p2860_p1 = pmov %p2859_p3 }
  0x7a   : > { %2165 = dma.done.wait (%p2860_p1), [#allocation5], 16   ;;  %p2861_p2 = pmov %p2860_p1 }
  0x7b   : > { %p2862_p4 = pmov %p2860_p1 }
  0x7c   : > { %2167 = vsyncadd (%p2861_p2), [#allocation5], 4294967280 }
  0x7d   : > { %2169 = dma.done.wait (%p2862_p4), [#allocation10], 32   ;;  %p2863_p8 = pmov %p2860_p1 }
  0x7f   : > { %2171 = vsyncadd (%p2863_p8), [#allocation10], 4294967264 }
  0x80   : > { %274 = sfence }
  0x81   : > { %v2424_v0 = vld [vmem:[%s2405_s15 + $0x4] ss:$16 sps:$4 sm:$0xff]   ;;  %v2427_v1 = vld [vmem:[%s2405_s15] ss:$16 sps:$4 sm:$0xff]   ;;  %s2201_s24 = smov 127   ;;  %v2202_v4 = vmov 0.0  }
  0x82   : > { %325 = vrot.lane.b32.xlu0 %v2424_v0, %s2201_s24  ;;  %v2011_v2 = vld [vmem:[%s2405_s15 + $0x8] ss:$16 sps:$4 sm:$0xff]   ;;  %323 = vrot.lane.b32.xlu1 %v2427_v1, %s2201_s24  ;;  %v2013_v3 = vld [vmem:[%s2405_s15 + $0xc] ss:$16 sps:$4 sm:$0xff]   ;;  %vm2203_vm0 = vmmov 0   ;;  %v2204_v5 = vmov 0  }
  0x83   : > { %1849 = vmatprep.subr.bf16.mxu1 %v2202_v4  ;;  %1851 = vmatprep.mubr.msk.bf16.mxu1 %vm2203_vm0, %v2202_v4  ;;  %s2205_s29 = smov 126   ;;  %s2206_s23 = smov 110   ;;  %vm331_vm1 = vcmask 1039360   ;;  %v306_v13 = vld [vmem:[#allocation6 + $0x2] sm:$0x3]  ;;  %vm338_vm2 = vcmask 130048  }
  0x84   : > { %374 = vmatprep.mubr.bf16.mxu0 %v2204_v5  ;;  %s2207_s27 = smov 109   ;;  %s2208_s28 = smov 108   ;;  %vm525_vm3 = vcmask 1031168   ;;  %v2014_v14 = vld [vmem:[%s2405_s15 + $0x8] ss:$16 sps:$4 sm:$0xff]   ;;  %vm629_vm4 = vcmask 900096  }
  0x85   : > { %s2209_s30 = smov 92   ;;  %s2210_s13 = smov 91   ;;  %v302_v20 = vld [vmem:[#allocation6] sm:$0x3]  ;;  %v516_v28 = vld [vmem:[#allocation6 + $0x4] sm:$0x3] }
  0x86   : > { %327 = vrot.lane.b32.xlu0 %v2011_v2, %s2201_s24  ;;  %329 = vrot.lane.b32.xlu1 %v2013_v3, %s2201_s24  ;;  %s2211_s16 = smov 90   ;;  %vm733_vm5 = vcmask 891904   ;;  %v620_v36 = vld [vmem:[#allocation6 + $0x6] sm:$0x3]  ;;  %vm837_vm6 = vcmask 883712   ;;  %vm941_vm7 = vcmask 752640  }
  0x87   : > { %v724_v44 = vld [vmem:[#allocation6 + $0x8] sm:$0x3]  ;;  %v828_v52 = vld [vmem:[#allocation6 + $0xa] sm:$0x3]  ;;  %vm1045_vm8 = vcmask 744448   ;;  %vm1149_vm9 = vcmask 736256  }
  0x88   : > { %v932_v60 = vld [vmem:[#allocation6 + $0xc] sm:$0x3]  ;;  %s2533_s17 = sld [smem:[#allocation8]]  ;;  %p2866_p6 = scmp.ne.s32.totalorder %s2853_s12, 0 }
  0x89   : > { %s2535_s26 = sld [smem:[#allocation8 + $0x1]] }
  0x8a   : > { %519 = vrot.lane.b32.xlu0 %v2424_v0, %s2205_s29  ;;  %521 = vrot.lane.b32.xlu1 %v2011_v2, %s2205_s29  ;;  %s2537_s6 = sld [smem:[#allocation8 + $0x2]] }
  0x8b   : > { %s2541_s8 = sld [smem:[#allocation8 + $0x3]] }
  0x8c   : > { %s2543_s11 = sld [smem:[#allocation9]] }
  0x8d   : > { %s2545_s14 = sld [smem:[#allocation9 + $0x1]] }
  0x8e   : > { %517 = vrot.lane.b32.xlu0 %v2427_v1, %s2205_s29  ;;  %523 = vrot.lane.b32.xlu1 %v2013_v3, %s2205_s29  ;;  %s2547_s15 = sld [smem:[#allocation9 + $0x2]] }
  0x8f   : > { %s2549_s24 = sld [smem:[#allocation9 + $0x3]] }
  0x90   : > { %s2551_s29 = sld [smem:[#allocation9 + $0x4]] }
  0x91   : > { %s2567_s0 = sld [smem:[#allocation11 + $0x1]] }
  0x92   : > { %623 = vrot.lane.b32.xlu0 %v2424_v0, %s2206_s23  ;;  %625 = vrot.lane.b32.xlu1 %v2011_v2, %s2206_s23  ;;  %s2569_s1 = sld [smem:[#allocation9 + $0xa]] }
  0x93   : > { %s2571_s2 = sld [smem:[#allocation9 + $0xb]] }
  0x94   : > { %s2573_s3 = sld [smem:[#allocation11 + $0x2]] }
  0x95   : > { %s2577_s4 = sld [smem:[#allocation9 + $0xc]] }
  0x96   : > { %621 = vrot.lane.b32.xlu0 %v2427_v1, %s2206_s23  ;;  %627 = vrot.lane.b32.xlu1 %v2013_v3, %s2206_s23  ;;  %s2553_s23 = sld [smem:[#allocation9 + $0x5]] }
  0x97   : > { %s2579_s7 = sld [smem:[#allocation9 + $0xd]] }
  0x98   : > { %s2590_s20 = sld [smem:[#allocation9 + $0xe]] }
  0x9a   : > { %727 = vrot.lane.b32.xlu0 %v2424_v0, %s2207_s27  ;;  %729 = vrot.lane.b32.xlu1 %v2011_v2, %s2207_s27 }
  0x9e   : > { %725 = vrot.lane.b32.xlu0 %v2427_v1, %s2207_s27  ;;  %731 = vrot.lane.b32.xlu1 %v2013_v3, %s2207_s27  ;;  %s2555_s27 = sld [smem:[#allocation9 + $0x6]] }
  0xa2   : > { %831 = vrot.lane.b32.xlu0 %v2424_v0, %s2208_s28  ;;  %833 = vrot.lane.b32.xlu1 %v2011_v2, %s2208_s28 }
  0xa6   : > { %829 = vrot.lane.b32.xlu0 %v2427_v1, %s2208_s28  ;;  %835 = vrot.lane.b32.xlu1 %v2013_v3, %s2208_s28  ;;  %s2559_s28 = sld [smem:[#allocation9 + $0x7]] }
  0xaa   : > { %935 = vrot.lane.b32.xlu0 %v2424_v0, %s2209_s30  ;;  %937 = vrot.lane.b32.xlu1 %v2011_v2, %s2209_s30 }
  0xae   : > { %933 = vrot.lane.b32.xlu0 %v2427_v1, %s2209_s30  ;;  %939 = vrot.lane.b32.xlu1 %v2013_v3, %s2209_s30  ;;  %s2561_s30 = sld [smem:[#allocation9 + $0x8]] }
  0xb2   : > { %1039 = vrot.lane.b32.xlu0 %v2424_v0, %s2210_s13  ;;  %1041 = vrot.lane.b32.xlu1 %v2011_v2, %s2210_s13 }
  0xb6   : > { %1037 = vrot.lane.b32.xlu0 %v2427_v1, %s2210_s13  ;;  %1043 = vrot.lane.b32.xlu1 %v2013_v3, %s2210_s13  ;;  %s2563_s13 = sld [smem:[#allocation9 + $0x9]] }
  0xba   : > { %1143 = vrot.lane.b32.xlu0 %v2424_v0, %s2211_s16  ;;  %1145 = vrot.lane.b32.xlu1 %v2011_v2, %s2211_s16 }
  0xbe   : > { %1141 = vrot.lane.b32.xlu0 %v2427_v1, %s2211_s16  ;;  %1147 = vrot.lane.b32.xlu1 %v2013_v3, %s2211_s16  ;;  %s2565_s16 = sld [smem:[#allocation11]] }
  0xf4   : > { %v326_v6 = vpop.permute.xlu0 %325  ;;  %v324_v7 = vpop.permute.xlu1 %323 }
  0xf5   : > { %v332_v12 = vsel %vm331_vm1, %v324_v7, %v326_v6 }
  0xf8   : > { %v328_v8 = vpop.permute.xlu0 %327  ;;  %v330_v9 = vpop.permute.xlu1 %329 }
  0xf9   : > { %v333_v10 = vsel %vm331_vm1, %v326_v6, %v328_v8  ;;  %v334_v11 = vsel %vm331_vm1, %v328_v8, %v330_v9  ;;  %v1036_v6 = vld [vmem:[#allocation6 + $0xe] sm:$0x3]  ;;  %v1140_v9 = vld [vmem:[#allocation6 + $0x10] sm:$0x3] }
  0xfa   : > { %356 = vmatprep.subr.bf16.mxu0 %v333_v10  ;;  %1850 = vmatpush3.bf16.msra.mxu1 %v334_v11 }
  0xfb   : > { %357 = vmatpush1.bf16.msra.mxu0 %v332_v12  ;;  %1855 = vmatprep.subr.bf16.mxu1 %v2202_v4 }
  0xfc   : > { %v520_v15 = vpop.permute.xlu0 %519  ;;  %448 = vmatprep.subr.bf16.mxu0 %v2424_v0  ;;  %v522_v16 = vpop.permute.xlu1 %521 }
  0xfd   : > { %1852 = vmatmul.mubr.msk.bf16.vlgmr.msra.gmra.mxu1 %vm338_vm2, %v306_v13  ;;  %v527_v17 = vsel %vm525_vm3, %v520_v15, %v522_v16 }
  0xfe   : > { %1784 = vmatmul.mubr.msk.bf16.vlgmr.msra.gmra.mxu0 %vm338_vm2, %v306_v13  ;;  %1856 = vmatpush3.bf16.msra.mxu1 %v2014_v14 }
  0xff   : > { %449 = vmatpush1.bf16.msra.mxu0 %v2427_v1  ;;  %1857 = vmatprep.mubr.msk.bf16.mxu1 %vm2203_vm0, %v2202_v4 }
 0x100   : > { %v518_v18 = vpop.permute.xlu0 %517  ;;  %549 = vmatprep.subr.bf16.mxu0 %v527_v17  ;;  %v524_v19 = vpop.permute.xlu1 %523  ;;  %466 = vmatprep.mubr.bf16.mxu0 %v2204_v5 }
 0x101   : > { %1861 = vmatprep.subr.bf16.mxu1 %v2202_v4  ;;  %v526_v21 = vsel %vm525_vm3, %v518_v18, %v520_v15  ;;  %v528_v22 = vsel %vm525_vm3, %v522_v16, %v524_v19 }
 0x104   : > { %v624_v23 = vpop.permute.xlu0 %623  ;;  %v626_v24 = vpop.permute.xlu1 %625 }
 0x105   : > { %1858 = vmatmul.mubr.msk.bf16.vlgmr.msra.gmra.mxu1 %vm338_vm2, %v302_v20  ;;  %v631_v25 = vsel %vm629_vm4, %v624_v23, %v626_v24 }
 0x106   : > { %1787 = vmatmul.mubr.msk.bf16.vlgmr.msra.gmra.mxu0 %vm338_vm2, %v302_v20  ;;  %1862 = vmatpush3.bf16.msra.mxu1 %v528_v22 }
 0x107   : > { %550 = vmatpush1.bf16.msra.mxu0 %v526_v21  ;;  %1863 = vmatprep.mubr.msk.bf16.mxu1 %vm2203_vm0, %v2202_v4 }
 0x108   : > { %v622_v26 = vpop.permute.xlu0 %621  ;;  %653 = vmatprep.subr.bf16.mxu0 %v631_v25  ;;  %v628_v27 = vpop.permute.xlu1 %627  ;;  %567 = vmatprep.mubr.bf16.mxu0 %v2204_v5 }
 0x109   : > { %1867 = vmatprep.subr.bf16.mxu1 %v2202_v4  ;;  %v630_v29 = vsel %vm629_vm4, %v622_v26, %v624_v23  ;;  %v632_v30 = vsel %vm629_vm4, %v626_v24, %v628_v27 }
 0x10c   : > { %v728_v31 = vpop.permute.xlu0 %727  ;;  %v730_v32 = vpop.permute.xlu1 %729 }
 0x10d   : > { %1864 = vmatmul.mubr.msk.bf16.vlgmr.msra.gmra.mxu1 %vm338_vm2, %v516_v28  ;;  %v735_v33 = vsel %vm733_vm5, %v728_v31, %v730_v32 }
 0x10e   : > { %1789 = vmatmul.mubr.msk.bf16.vlgmr.msra.gmra.mxu0 %vm338_vm2, %v516_v28  ;;  %1868 = vmatpush3.bf16.msra.mxu1 %v632_v30 }
 0x10f   : > { %654 = vmatpush1.bf16.msra.mxu0 %v630_v29  ;;  %1869 = vmatprep.mubr.msk.bf16.mxu1 %vm2203_vm0, %v2202_v4 }
 0x110   : > { %v726_v34 = vpop.permute.xlu0 %725  ;;  %757 = vmatprep.subr.bf16.mxu0 %v735_v33  ;;  %v732_v35 = vpop.permute.xlu1 %731  ;;  %671 = vmatprep.mubr.bf16.mxu0 %v2204_v5 }
 0x111   : > { %1873 = vmatprep.subr.bf16.mxu1 %v2202_v4  ;;  %v734_v37 = vsel %vm733_vm5, %v726_v34, %v728_v31  ;;  %v736_v38 = vsel %vm733_vm5, %v730_v32, %v732_v35 }
 0x114   : > { %v832_v39 = vpop.permute.xlu0 %831  ;;  %v834_v40 = vpop.permute.xlu1 %833 }
 0x115   : > { %1870 = vmatmul.mubr.msk.bf16.vlgmr.msra.gmra.mxu1 %vm338_vm2, %v620_v36  ;;  %v839_v41 = vsel %vm837_vm6, %v832_v39, %v834_v40 }
 0x116   : > { %1791 = vmatmul.mubr.msk.bf16.vlgmr.msra.gmra.mxu0 %vm338_vm2, %v620_v36  ;;  %1874 = vmatpush3.bf16.msra.mxu1 %v736_v38 }
 0x117   : > { %758 = vmatpush1.bf16.msra.mxu0 %v734_v37  ;;  %1875 = vmatprep.mubr.msk.bf16.mxu1 %vm2203_vm0, %v2202_v4 }
 0x118   : > { %v830_v42 = vpop.permute.xlu0 %829  ;;  %861 = vmatprep.subr.bf16.mxu0 %v839_v41  ;;  %v836_v43 = vpop.permute.xlu1 %835  ;;  %775 = vmatprep.mubr.bf16.mxu0 %v2204_v5 }
 0x119   : > { %1879 = vmatprep.subr.bf16.mxu1 %v2202_v4  ;;  %v838_v45 = vsel %vm837_vm6, %v830_v42, %v832_v39  ;;  %v840_v46 = vsel %vm837_vm6, %v834_v40, %v836_v43 }
 0x11c   : > { %v936_v47 = vpop.permute.xlu0 %935  ;;  %v938_v48 = vpop.permute.xlu1 %937 }
 0x11d   : > { %1876 = vmatmul.mubr.msk.bf16.vlgmr.msra.gmra.mxu1 %vm338_vm2, %v724_v44  ;;  %v943_v49 = vsel %vm941_vm7, %v936_v47, %v938_v48 }
 0x11e   : > { %1793 = vmatmul.mubr.msk.bf16.vlgmr.msra.gmra.mxu0 %vm338_vm2, %v724_v44  ;;  %1880 = vmatpush3.bf16.msra.mxu1 %v840_v46 }
 0x11f   : > { %862 = vmatpush1.bf16.msra.mxu0 %v838_v45  ;;  %1881 = vmatprep.mubr.msk.bf16.mxu1 %vm2203_vm0, %v2202_v4 }
 0x120   : > { %v934_v50 = vpop.permute.xlu0 %933  ;;  %965 = vmatprep.subr.bf16.mxu0 %v943_v49  ;;  %v940_v51 = vpop.permute.xlu1 %939  ;;  %879 = vmatprep.mubr.bf16.mxu0 %v2204_v5 }
 0x121   : > { %1885 = vmatprep.subr.bf16.mxu1 %v2202_v4  ;;  %v942_v53 = vsel %vm941_vm7, %v934_v50, %v936_v47  ;;  %v944_v54 = vsel %vm941_vm7, %v938_v48, %v940_v51 }
 0x124   : > { %v1040_v55 = vpop.permute.xlu0 %1039  ;;  %v1042_v56 = vpop.permute.xlu1 %1041 }
 0x125   : > { %1882 = vmatmul.mubr.msk.bf16.vlgmr.msra.gmra.mxu1 %vm338_vm2, %v828_v52  ;;  %v1047_v57 = vsel %vm1045_vm8, %v1040_v55, %v1042_v56 }
 0x126   : > { %1795 = vmatmul.mubr.msk.bf16.vlgmr.msra.gmra.mxu0 %vm338_vm2, %v828_v52  ;;  %1886 = vmatpush3.bf16.msra.mxu1 %v944_v54 }
 0x127   : > { %966 = vmatpush1.bf16.msra.mxu0 %v942_v53  ;;  %1887 = vmatprep.mubr.msk.bf16.mxu1 %vm2203_vm0, %v2202_v4 }
 0x128   : > { %v1038_v58 = vpop.permute.xlu0 %1037  ;;  %1069 = vmatprep.subr.bf16.mxu0 %v1047_v57  ;;  %v1044_v59 = vpop.permute.xlu1 %1043  ;;  %983 = vmatprep.mubr.bf16.mxu0 %v2204_v5 }
 0x129   : > { %1891 = vmatprep.subr.bf16.mxu1 %v2202_v4  ;;  %v1046_v61 = vsel %vm1045_vm8, %v1038_v58, %v1040_v55  ;;  %v1048_v62 = vsel %vm1045_vm8, %v1042_v56, %v1044_v59 }
 0x12c   : > { %v1144_v63 = vpop.permute.xlu0 %1143  ;;  %v1146_v0 = vpop.permute.xlu1 %1145 }
 0x12d   : > { %1888 = vmatmul.mubr.msk.bf16.vlgmr.msra.gmra.mxu1 %vm338_vm2, %v932_v60  ;;  %v1151_v1 = vsel %vm1149_vm9, %v1144_v63, %v1146_v0 }
 0x12e   : > { %1797 = vmatmul.mubr.msk.bf16.vlgmr.msra.gmra.mxu0 %vm338_vm2, %v932_v60  ;;  %1892 = vmatpush3.bf16.msra.mxu1 %v1048_v62 }
 0x12f   : > { %1070 = vmatpush1.bf16.msra.mxu0 %v1046_v61  ;;  %1893 = vmatprep.mubr.msk.bf16.mxu1 %vm2203_vm0, %v2202_v4 }
 0x130   : > { %1173 = vmatprep.subr.bf16.mxu0 %v1151_v1  ;;  %v1142_v2 = vpop.permute.xlu0 %1141  ;;  %v1148_v3 = vpop.permute.xlu1 %1147  ;;  %1087 = vmatprep.mubr.bf16.mxu0 %v2204_v5 }
 0x131   : > { %1897 = vmatprep.subr.bf16.mxu1 %v2202_v4  ;;  %v1150_v7 = vsel %vm1149_vm9, %v1142_v2, %v1144_v63  ;;  %v1152_v8 = vsel %vm1149_vm9, %v1146_v0, %v1148_v3 }
 0x135   : > { %1894 = vmatmul.mubr.msk.bf16.vlgmr.msra.gmra.mxu1 %vm338_vm2, %v1036_v6 }
 0x136   : > { %1799 = vmatmul.mubr.msk.bf16.vlgmr.msra.gmra.mxu0 %vm338_vm2, %v1036_v6  ;;  %1898 = vmatpush3.bf16.msra.mxu1 %v1152_v8 }
 0x137   : > { %1174 = vmatpush1.bf16.msra.mxu0 %v1150_v7  ;;  %1899 = vmatprep.mubr.msk.bf16.mxu1 %vm2203_vm0, %v2202_v4 }
 0x138   : > { %1191 = vmatprep.mubr.bf16.mxu0 %v2204_v5 }
 0x13d   : > { %1900 = vmatmul.mubr.msk.bf16.vlgmr.msra.gmra.mxu1 %vm338_vm2, %v1140_v9 }
 0x13e   : > { %1801 = vmatmul.mubr.msk.bf16.vlgmr.msra.gmra.mxu0 %vm338_vm2, %v1140_v9 }
 0x1bd   : > { %v417_v10 = vpop.f32.mrf.mxu1 }
 0x1be   : > { %v376_v11 = vpop.f32.mrf.mxu0 }
 0x1bf   : > { %v1853_v12 = vpop.f32.mrf.mxu1 }
 0x1c0   : > { %v378_v13 = vpop.f32.mrf.mxu0 }
 0x1c1   : > { %v420_v14 = vpop.f32.mrf.mxu1 }
 0x1c2   : > { %v380_v15 = vpop.f32.mrf.mxu0 }
 0x1c3   : > { %v1854_v16 = vpop.f32.mrf.mxu1 }
 0x1c4   : > { %v381_v17 = vpop.f32.mrf.mxu0 }
 0x1c5   : > { %v509_v18 = vpop.f32.mrf.mxu1 }
 0x1c6   : > { %v468_v19 = vpop.f32.mrf.mxu0  ;;  %v510_v20 = vadd.f32 %v509_v18, %v417_v10 }
 0x1c7   : > { %v469_v21 = vadd.f32 %v468_v19, %v376_v11  ;;  %v1859_v4 = vpop.f32.mrf.mxu1  ;;  %v2582_v19 = vstv %s2533_s17  ;;  %s2601_s17 = sld [smem:[#allocation9 + $0xf]] }
 0x1c8   : > { %v470_v22 = vpop.f32.mrf.mxu0 }
 0x1c9   : > { %v2525_v5 = vadd.f32 %v470_v22, %v378_v13  ;;  %v512_v23 = vpop.f32.mrf.mxu1  ;;  %v2593_v22 = vstv %s2541_s8  ;;  %s2213_s8 = smov [#allocation12]  }
 0x1ca   : > { %v472_v24 = vpop.f32.mrf.mxu0  ;;  %v2596_v23 = vstv %s2543_s11  ;;  %s2118_s11 = sshll.u32 %s2213_s8, 4  ;;  %s2119_s11 = int_to_ptr.vmem [resolvable:$false] %s2118_s11 }
 0x1cb   : > { %v1860_v25 = vpop.f32.mrf.mxu1  ;;  %v2599_v24 = vstv %s2545_s14  ;;  %s2120_s14 = scalar_lea.vmem %s2119_s11, 384 }
 0x1cc   : > { %v473_v26 = vpop.f32.mrf.mxu0 }
 0x1cd   : > { %v610_v27 = vpop.f32.mrf.mxu1 }
 0x1ce   : > { %v569_v28 = vpop.f32.mrf.mxu0  ;;  %v618_v1 = vadd.f32 %v610_v27, %v510_v20  ;;  %v2585_v20 = vstv %s2535_s26  ;;  %s2612_s26 = sld [smem:[#allocation11 + $0x3]] }
 0x1cf   : > { %v1865_v29 = vpop.f32.mrf.mxu1  ;;  %v616_v2 = vadd.f32 %v569_v28, %v469_v21  ;;  %v2588_v21 = vstv %s2537_s6  ;;  %v2604_v28 = vstv %s2547_s15 }
 0x1d0   : > { %v2527_v30 = vpop.f32.mrf.mxu0  ;;  %v2607_v29 = vstv %s2549_s24 }
 0x1d1   : > { %v613_v31 = vpop.f32.mrf.mxu1 }
 0x1d2   : > { %v573_v32 = vpop.f32.mrf.mxu0  ;;  %v2610_v31 = vstv %s2551_s29 }
 0x1d3   : > { %v1866_v33 = vpop.f32.mrf.mxu1 }
 0x1d4   : > { %v574_v34 = vpop.f32.mrf.mxu0  ;;  %v2615_v33 = vstv %s2553_s23 }
 0x1d5   : > { %v714_v35 = vpop.f32.mrf.mxu1  ;;  %v2618_v34 = vstv %s2555_s27 }
 0x1d6   : > { %v673_v36 = vpop.f32.mrf.mxu0  ;;  %v722_v7 = vadd.f32 %v714_v35, %v618_v1 }
 0x1d7   : > { %v1871_v37 = vpop.f32.mrf.mxu1  ;;  %v720_v8 = vadd.f32 %v673_v36, %v616_v2 }
 0x1d8   : > { %v2529_v38 = vpop.f32.mrf.mxu0  ;;  %v2621_v37 = vstv %s2559_s28 }
 0x1d9   : > { %v717_v39 = vpop.f32.mrf.mxu1 }
 0x1da   : > { %v677_v40 = vpop.f32.mrf.mxu0  ;;  %v2624_v39 = vstv %s2561_s30 }
 0x1db   : > { %v1872_v41 = vpop.f32.mrf.mxu1  ;;  %v2627_v40 = vstv %s2563_s13 }
 0x1dc   : > { %v678_v42 = vpop.f32.mrf.mxu0 }
 0x1dd   : > { %v818_v43 = vpop.f32.mrf.mxu1 }
 0x1de   : > { %v777_v44 = vpop.f32.mrf.mxu0  ;;  %v826_v11 = vadd.f32 %v818_v43, %v722_v7  ;;  %v2630_v43 = vstv %s2565_s16  ;;  %v2661_v7 = vstv %s2590_s20 }
 0x1df   : > { %v1877_v45 = vpop.f32.mrf.mxu1  ;;  %v824_v12 = vadd.f32 %v777_v44, %v720_v8  ;;  %v2633_v44 = vstv %s2567_s0  ;;  %s1903_s0 = smul.u32 12, %s2401_s10 }
 0x1e0   : > { %v2531_v46 = vpop.f32.mrf.mxu0  ;;  %v2636_v45 = vstv %s2569_s1  ;;  %s1904_s1 = smul.u32 192, %s2265_s22  ;;  %s1639_s22 = scalar_lea.sflag [#allocation4], %s2401_s10 }
 0x1e1   : > { %v821_v47 = vpop.f32.mrf.mxu1 }
 0x1e2   : > { %v781_v48 = vpop.f32.mrf.mxu0  ;;  %v2639_v47 = vstv %s2571_s2  ;;  %s296_s2 = scalar_lea.vmem [#allocation12], %s1903_s0 }
 0x1e3   : > { %v1878_v49 = vpop.f32.mrf.mxu1 }
 0x1e4   : > { %v782_v50 = vpop.f32.mrf.mxu0 }
 0x1e5   : > { %v922_v51 = vpop.f32.mrf.mxu1 }
 0x1e6   : > { %v881_v52 = vpop.f32.mrf.mxu0  ;;  %v930_v15 = vadd.f32 %v922_v51, %v826_v11  ;;  %v2212_v51 = vmov 1966171168  }
 0x1e7   : > { %v1883_v53 = vpop.f32.mrf.mxu1  ;;  %v928_v16 = vadd.f32 %v881_v52, %v824_v12  ;;  %v2643_v52 = vunpack.c.l.s4 %v2212_v51 }
 0x1e8   : > { %v2539_v54 = vpop.f32.mrf.mxu0  ;;  %v1343_v53 = vlaneseq }
 0x1e9   : > { %v925_v55 = vpop.f32.mrf.mxu1  ;;  %v1342_v11 = vunpack.c.0.s8 %v2643_v52 }
 0x1ea   : > { %v885_v56 = vpop.f32.mrf.mxu0  ;;  %vm2765_vm10 = vcmp.lt.s32.totalorder %v1343_v53, 384 }
 0x1eb   : > { %v1884_v57 = vpop.f32.mrf.mxu1 }
 0x1ec   : > { %v886_v58 = vpop.f32.mrf.mxu0 }
 0x1ed   : > { %v1026_v59 = vpop.f32.mrf.mxu1 }
 0x1ee   : > { %v985_v60 = vpop.f32.mrf.mxu0  ;;  %v1034_v4 = vadd.f32 %v1026_v59, %v930_v15  ;;  %v617_v59 = vadd.f32 %v2527_v30, %v2525_v5 }
 0x1ef   : > { %v1889_v61 = vpop.f32.mrf.mxu1  ;;  %v1032_v25 = vadd.f32 %v985_v60, %v928_v16  ;;  %v2652_v60 = vstv %s2573_s3  ;;  %v1344_v16 = vshrl.u32 %v1343_v53, 7  ;;  %s1653_s3 = sshll.u32 %s296_s2, 4  ;;  %s1654_s3 = int_to_ptr.vmem [resolvable:$true] %s1653_s3 }
 0x1f0   : > { %v2557_v62 = vpop.f32.mrf.mxu0  ;;  %v2655_v61 = vstv %s2577_s4  ;;  %v721_v8 = vadd.f32 %v2529_v38, %v617_v59  ;;  %s2114_s6 = scalar_lea.vmem %s1654_s3, 192  ;;  %p2121_p12 = scmp.lt.s32.totalorder %s1654_s3, %s2119_s11 }
 0x1f1   : > { %v1029_v63 = vpop.f32.mrf.mxu1  ;;  %p2115_p13 = scmp.ne.s32.totalorder %s1654_s3, %s2114_s6  ;;  %p2122_p5 = scmp.lt.s32.totalorder %s2120_s14, %s2114_s6 }
 0x1f2   : > { %v989_v0 = vpop.f32.mrf.mxu0  ;;  %v2658_v63 = vstv %s2579_s7  ;;  %s2785_s7 = scalar_lea.hbm %s2831_s5, %s1904_s1 }
 0x1f3   : > { %v1890_v3 = vpop.f32.mrf.mxu1  ;;  %p2116_p9 = pnand %p2115_p13, %p2866_p6  ;;  %p2123_p0 = por %p2122_p5, %p2121_p12 }
 0x1f4   : > { %v990_v6 = vpop.f32.mrf.mxu0 }
 0x1f5   : > { %v1130_v9 = vpop.f32.mrf.mxu1  ;;  %p2117_p10 = pneg %p2116_p9 }
 0x1f6   : > { %v1089_v10 = vpop.f32.mrf.mxu0  ;;  %v1138_v32 = vadd.f32 %v1130_v9, %v1034_v4  ;;  %v2665_v9 = vstv %s2601_s17 }
 0x1f7   : > { %v1895_v13 = vpop.f32.mrf.mxu1  ;;  %v1136_v35 = vadd.f32 %v1089_v10, %v1032_v25  ;;  %v2668_v10 = vstv %s2612_s26  ;;  %p2124_p7 = pnand %p2123_p0, %p2117_p10 }
 0x1f8   : > { %v2575_v14 = vpop.f32.mrf.mxu0 }
 0x1f9   : > { %v1133_v17 = vpop.f32.mrf.mxu1 }
 0x1fa   : > { %v1093_v18 = vpop.f32.mrf.mxu0  ;;  %v825_v17 = vadd.f32 %v2531_v46, %v721_v8 }
 0x1fb   : > { %v1896_v26 = vpop.f32.mrf.mxu1 }
 0x1fc   : > { %v1094_v27 = vpop.f32.mrf.mxu0 }
 0x1fd   : > { %v1234_v36 = vpop.f32.mrf.mxu1 }
 0x1fe   : > { %v1193_v41 = vpop.f32.mrf.mxu0  ;;  %v1242_v42 = vadd.f32 %v1234_v36, %v1138_v32 }
 0x1ff   : > { %v1240_v48 = vadd.f32 %v1193_v41, %v1136_v35  ;;  %v1901_v49 = vpop.f32.mrf.mxu1  ;;  %v929_v35 = vadd.f32 %v2539_v54, %v825_v17 }
 0x200   : > { %v2641_v50 = vpop.f32.mrf.mxu0  ;;  %v1247_v55 = vadd.f32 %v2582_v19, %v1242_v42  ;;  %v1255_v56 = vadd.f32 %v2585_v20, %v1242_v42  ;;  %v1263_v57 = vadd.f32 %v2588_v21, %v1242_v42  ;;  %v1271_v58 = vadd.f32 %v2593_v22, %v1242_v42 }
 0x201   : > { %v1237_v0 = vpop.f32.mrf.mxu1  ;;  %v1253_v15 = vadd.f32 %v2585_v20, %v1240_v48  ;;  %v1245_v38 = vadd.f32 %v2582_v19, %v1240_v48  ;;  %v1261_v4 = vadd.f32 %v2588_v21, %v1240_v48  ;;  %v1269_v52 = vadd.f32 %v2593_v22, %v1240_v48 }
 0x202   : > { %v1197_v1 = vpop.f32.mrf.mxu0  ;;  %v1250_v2 = vmax.f32 %v1247_v55, 0.0  ;;  %v1258_v3 = vmax.f32 %v1255_v56, 0.0  ;;  %v1266_v6 = vmax.f32 %v1263_v57, 0.0  ;;  %v1274_v12 = vmax.f32 %v1271_v58, 0.0 }
 0x203   : > { %v1902_v5 = vpop.f32.mrf.mxu1  ;;  %v1256_v51 = vmax.f32 %v1253_v15, 0.0  ;;  %v1248_v54 = vmax.f32 %v1245_v38, 0.0  ;;  %v1264_v1 = vmax.f32 %v1261_v4, 0.0 }
 0x204   : > { %v1198_v30 = vpop.f32.mrf.mxu0  ;;  %v1284_v13 = vmul.f32 %v2599_v24, %v1258_v3  ;;  %v1377_v18 = vmul.f32 %v2615_v33, %v1258_v3  ;;  %v1279_v25 = vmul.f32 %v2596_v23, %v1250_v2  ;;  %v1301_v27 = vmul.f32 %v2604_v28, %v1266_v6 }
 0x205   : > { %v1394_v32 = vmul.f32 %v2618_v34, %v1266_v6  ;;  %v1372_v36 = vmul.f32 %v2610_v31, %v1250_v2  ;;  %v1467_v46 = vmul.f32 %v2627_v40, %v1258_v3  ;;  %v1318_v49 = vmul.f32 %v2607_v29, %v1274_v12 }
 0x206   : > { %v1290_v26 = vrot.slane %v1284_v13, 1  ;;  %v1383_v41 = vrot.slane %v1377_v18, 1  ;;  %v1411_v56 = vmul.f32 %v2621_v37, %v1274_v12  ;;  %v1557_v58 = vmul.f32 %v2658_v63, %v1258_v3 }
 0x207   : > { %v1473_v57 = vrot.slane %v1467_v46, 1  ;;  %v1307_v59 = vrot.slane %v1301_v27, 2  ;;  %v1400_v0 = vrot.slane %v1394_v32, 2  ;;  %v1462_v8 = vmul.f32 %v2624_v39, %v1250_v2 }
 0x208   : > { %v1296_v42 = vadd.f32 %v1290_v26, %v1279_v25  ;;  %v1389_v55 = vadd.f32 %v1383_v41, %v1372_v36  ;;  %v1484_v5 = vmul.f32 %v2636_v45, %v1266_v6  ;;  %v1563_v30 = vrot.slane %v1557_v58, 1 }
 0x209   : > { %v1574_v13 = vmul.f32 %v2661_v7, %v1266_v6  ;;  %v1552_v48 = vmul.f32 %v2655_v61, %v1250_v2  ;;  %v1282_v18 = vmul.f32 %v2599_v24, %v1256_v51  ;;  %v1324_v25 = vrot.slane %v1318_v49, 3 }
 0x20a   : > { %v1313_v15 = vadd.f32 %v1307_v59, %v1296_v42  ;;  %v1406_v17 = vadd.f32 %v1400_v0, %v1389_v55  ;;  %v1417_v26 = vrot.slane %v1411_v56, 3  ;;  %v1479_v3 = vadd.f32 %v1473_v57, %v1462_v8 }
 0x20b   : > { %v1272_v27 = vmax.f32 %v1269_v52, 0.0  ;;  %v1569_v32 = vadd.f32 %v1563_v30, %v1552_v48  ;;  %v1277_v38 = vmul.f32 %v2596_v23, %v1248_v54  ;;  %v1288_v4 = vrot.slane %v1282_v18, 1 }
 0x20c   : > { %v1299_v36 = vmul.f32 %v2604_v28, %v1264_v1  ;;  %v1490_v41 = vrot.slane %v1484_v5, 2  ;;  %v1501_v46 = vmul.f32 %v2639_v47, %v1274_v12  ;;  %v1580_v6 = vrot.slane %v1574_v13, 2 }
 0x20d   : > { %v1591_v42 = vmul.f32 %v2665_v9, %v1274_v12  ;;  %v1330_v55 = vadd.f32 %v1324_v25, %v1313_v15  ;;  %v1423_v2 = vadd.f32 %v1417_v26, %v1406_v17  ;;  %v1294_v58 = vadd.f32 %v1288_v4, %v1277_v38 }
 0x20e   : > { %v1375_v49 = vmul.f32 %v2615_v33, %v1256_v51  ;;  %v1033_v56 = vadd.f32 %v2557_v62, %v929_v35  ;;  %v1496_v52 = vadd.f32 %v1490_v41, %v1479_v3  ;;  %v1316_v57 = vmul.f32 %v2607_v29, %v1272_v27 }
 0x20f   : > { %v2700_v59 = vsub.s32 %v1342_v11, %v1344_v16  ;;  %v1586_v0 = vadd.f32 %v1580_v6, %v1569_v32  ;;  %v1305_v8 = vrot.slane %v1299_v36, 2  ;;  %v1465_v30 = vmul.f32 %v2627_v40, %v1256_v51 }
 0x210   : > { %v1381_v5 = vrot.slane %v1375_v49, 1  ;;  %v1137_v13 = vadd.f32 %v2575_v14, %v1033_v56  ;;  %v1507_v12 = vrot.slane %v1501_v46, 3  ;;  %v1370_v15 = vmul.f32 %v2610_v31, %v1248_v54 }
 0x211   : > { %v1392_v17 = vmul.f32 %v2618_v34, %v1264_v1  ;;  %v2707_v48 = vadd.f32 %v2630_v43, %v1330_v55  ;;  %v2710_v62 = vadd.f32 %v2633_v44, %v1423_v2  ;;  %v1597_v11 = vrot.slane %v1591_v42, 3 }
 0x212   : > { %v1311_v16 = vadd.f32 %v1305_v8, %v1294_v58  ;;  %v2712_v35 = vadd.f32 %v1507_v12, %v1496_v52  ;;  %v1322_v18 = vrot.slane %v1316_v57, 3  ;;  %v1387_v25 = vadd.f32 %v1381_v5, %v1370_v15 }
 0x213   : > { %v1555_v26 = vmul.f32 %v2658_v63, %v1256_v51  ;;  %v2715_v14 = vadd.f32 %v1597_v11, %v1586_v0  ;;  %v1409_v3 = vmul.f32 %v2621_v37, %v1272_v27  ;;  %v1471_v32 = vrot.slane %v1465_v30, 1 }
 0x214   : > { %v1482_v38 = vmul.f32 %v2636_v45, %v1264_v1  ;;  %v1398_v4 = vrot.slane %v1392_v17, 2  ;;  %v1460_v36 = vmul.f32 %v2624_v39, %v1248_v54  ;;  %v1241_v46 = vadd.f32 %v2641_v50, %v1137_v13 }
 0x215   : > { %v1561_v41 = vrot.slane %v1555_v26, 1  ;;  %v1328_v6 = vadd.f32 %v1322_v18, %v1311_v16  ;;  %v1499_v42 = vmul.f32 %v2639_v47, %v1272_v27  ;;  %v1550_v55 = vmul.f32 %v2655_v61, %v1248_v54 }
 0x216   : > { %v1572_v51 = vmul.f32 %v2661_v7, %v1264_v1  ;;  %v1404_v2 = vadd.f32 %v1398_v4, %v1387_v25  ;;  %v1246_v58 = vadd.f32 %v2582_v19, %v1241_v46  ;;  %v1254_v49 = vadd.f32 %v2585_v20, %v1241_v46 }
 0x217   : > { %v1262_v56 = vadd.f32 %v2588_v21, %v1241_v46  ;;  %v1415_v52 = vrot.slane %v1409_v3, 3  ;;  %v1477_v57 = vadd.f32 %v1471_v32, %v1460_v36  ;;  %v1488_v0 = vrot.slane %v1482_v38, 2 }
 0x218   : > { %v1270_v8 = vadd.f32 %v2593_v22, %v1241_v46  ;;  %v1567_v50 = vadd.f32 %v1561_v41, %v1550_v55  ;;  %v1249_v5 = vmax.f32 %v1246_v58, 0.0  ;;  %v1257_v30 = vmax.f32 %v1254_v49, 0.0 }
 0x219   : > { %v1265_v13 = vmax.f32 %v1262_v56, 0.0  ;;  %v1333_v54 = vadd.f32 %v2630_v43, %v1328_v6  ;;  %v1505_v12 = vrot.slane %v1499_v42, 3  ;;  %v1589_v1 = vmul.f32 %v2665_v9, %v1272_v27 }
 0x21a   : > { %v1273_v15 = vmax.f32 %v1270_v8, 0.0  ;;  %v1421_v19 = vadd.f32 %v1415_v52, %v1404_v2  ;;  %v1578_v17 = vrot.slane %v1572_v51, 2  ;;  %v1283_v20 = vmul.f32 %v2599_v24, %v1257_v30 }
 0x21b   : > { %v1300_v21 = vmul.f32 %v2604_v28, %v1265_v13  ;;  %v1494_v11 = vadd.f32 %v1488_v0, %v1477_v57  ;;  %v1376_v22 = vmul.f32 %v2615_v33, %v1257_v30  ;;  %v1393_v18 = vmul.f32 %v2618_v34, %v1265_v13 }
 0x21c   : > { %v1317_v16 = vmul.f32 %v2607_v29, %v1273_v15  ;;  %v1584_v25 = vadd.f32 %v1578_v17, %v1567_v50  ;;  %v1278_v26 = vmul.f32 %v2596_v23, %v1249_v5  ;;  %v1289_v3 = vrot.slane %v1283_v20, 1 }
 0x21d   : > { %v1410_v27 = vmul.f32 %v2621_v37, %v1273_v15  ;;  %v1306_v32 = vrot.slane %v1300_v21, 2  ;;  %v1371_v4 = vmul.f32 %v2610_v31, %v1249_v5  ;;  %v1382_v24 = vrot.slane %v1376_v22, 1 }
 0x21e   : > { %v1323_v38 = vrot.slane %v1317_v16, 3  ;;  %v1295_v36 = vadd.f32 %v1289_v3, %v1278_v26  ;;  %v1399_v28 = vrot.slane %v1393_v18, 2  ;;  %v1466_v41 = vmul.f32 %v2627_v40, %v1257_v30 }
 0x21f   : > { %v1483_v29 = vmul.f32 %v2636_v45, %v1265_v13  ;;  %v1388_v33 = vadd.f32 %v1382_v24, %v1371_v4  ;;  %v1416_v46 = vrot.slane %v1410_v27, 3  ;;  %v1461_v34 = vmul.f32 %v2624_v39, %v1249_v5 }
 0x220   : > { %v1556_v23 = vmul.f32 %v2658_v63, %v1257_v30  ;;  %v1312_v6 = vadd.f32 %v1306_v32, %v1295_v36  ;;  %v1472_v42 = vrot.slane %v1466_v41, 1  ;;  %v1500_v37 = vmul.f32 %v2639_v47, %v1273_v15 }
 0x221   : > { %v1573_v55 = vmul.f32 %v2661_v7, %v1265_v13  ;;  %v1405_v31 = vadd.f32 %v1399_v28, %v1388_v33  ;;  %v1551_v51 = vmul.f32 %v2655_v61, %v1249_v5  ;;  %v1590_v40 = vmul.f32 %v2665_v9, %v1273_v15 }
 0x222   : > { %v1562_v2 = vrot.slane %v1556_v23, 1  ;;  %v1595_v58 = vrot.slane %v1589_v1, 3  ;;  %v1329_v45 = vadd.f32 %v1323_v38, %v1312_v6  ;;  %v1478_v49 = vadd.f32 %v1472_v42, %v1461_v34 }
 0x223   : > { %v1489_v56 = vrot.slane %v1483_v29, 2  ;;  %v1426_v39 = vadd.f32 %v2633_v44, %v1421_v19  ;;  %v1422_v52 = vadd.f32 %v1416_v46, %v1405_v31  ;;  %v1579_v57 = vrot.slane %v1573_v55, 2 }
 0x224   : > { %v1568_v63 = vadd.f32 %v1562_v2, %v1551_v51  ;;  %v1511_v0 = vadd.f32 %v1505_v12, %v1494_v11  ;;  %v1334_v47 = vadd.f32 %v2630_v43, %v1329_v45  ;;  %v1506_v8 = vrot.slane %v1500_v37, 3 }
 0x225   : > { %v1495_v7 = vadd.f32 %v1489_v56, %v1478_v49  ;;  %v1601_v50 = vadd.f32 %v1595_v58, %v1584_v25  ;;  %v1427_v61 = vadd.f32 %v2633_v44, %v1422_v52  ;;  %v1596_v9 = vrot.slane %v1590_v40, 3 }
 0x226   : > { %v1585_v5 = vadd.f32 %v1579_v57, %v1568_v63  ;;  %v1339_v13 = vcombine.low %v1333_v54, %v1334_v47  ;;  %v1518_v1 = vadd.f32 %v2652_v60, %v2712_v35  ;;  %v1608_v15 = vadd.f32 %v2668_v10, %v2715_v14 }
 0x227   : > { %v1512_v30 = vadd.f32 %v1506_v8, %v1495_v7  ;;  %v1432_v12 = vcombine.low %v1426_v39, %v1427_v61  ;;  %v1516_v43 = vadd.f32 %v2652_v60, %v1511_v0  ;;  %v1353_v44 = vrot.slane %v2707_v48, %v2700_v59 }
 0x228   : > { %v1602_v19 = vadd.f32 %v1596_v9, %v1585_v5  ;;  %v1346_v20 = vrot.slane %v1339_v13, %v2700_v59  ;;  %v1606_v54 = vadd.f32 %v2668_v10, %v1601_v50  ;;  %v1446_v14 = vrot.slane %v2710_v62, %v2700_v59 }
 0x229   : > { %v1517_v17 = vadd.f32 %v2652_v60, %v1512_v30  ;;  %v1439_v21 = vrot.slane %v1432_v12, %v2700_v59  ;;  %v1626_v3 = vrot.slane %v1608_v15, %v2700_v59 }
 0x22a   : > { %v1607_v35 = vadd.f32 %v2668_v10, %v1602_v19  ;;  %v1354_v11 = vcombine.low %v1346_v20, %v1353_v44  ;;  %v1536_v10 = vrot.slane %v1518_v1, %v2700_v59 }
 0x22b   : > { %v1522_v16 = vcombine.low %v1516_v43, %v1517_v17  ;;  %v1447_v22 = vcombine.low %v1439_v21, %v1446_v14 }
 0x22c   : > { %v1612_v18 = vcombine.low %v1606_v54, %v1607_v35  ;;  %v1361_v48 = vrot.slane %v1354_v11, %v2700_v59 }
 0x22d   : > { %v1529_v25 = vrot.slane %v1522_v16, %v2700_v59  ;;  %v1454_v26 = vrot.slane %v1447_v22, %v2700_v59 }
 0x22e   : > { %v1619_v62 = vrot.slane %v1612_v18, %v2700_v59  ;;  %1367 = vst.msk [vmem:[%s296_s2] ss:$4 sm:$0x7] %vm2765_vm10, %v1361_v48 }
 0x22f   : > { %v1537_v53 = vcombine.low %v1529_v25, %v1536_v10  ;;  %1814 = vst.msk [vmem:[%s296_s2 + $0x1] ss:$4 sm:$0x7] %vm2765_vm10, %v1454_v26 }
 0x230   : > { %v1627_v27 = vcombine.low %v1619_v62, %v1626_v3 }
 0x231   : > { %v1544_v32 = vrot.slane %v1537_v53, %v2700_v59 }
 0x232   : > { %v1634_v38 = vrot.slane %v1627_v27, %v2700_v59 }
 0x233   : > { %1820 = vst.msk [vmem:[%s296_s2 + $0x2] ss:$4 sm:$0x7] %vm2765_vm10, %v1544_v32 }
 0x234   : > { %1826 = vst.msk [vmem:[%s296_s2 + $0x3] ss:$4 sm:$0x7] %vm2765_vm10, %v1634_v38 }
 0x235   : > { %2127 = shalt.err (!%p2124_p7)
}
 0x236   : > { %s2128_s15 = scalar_lea.hbm %s2785_s7, 192  ;;  %s2132_s29 = scalar_lea.hbm %s2831_s5, 384 }
 0x237   : > { %p2129_p11 = scmp.ne.s32.totalorder %s2785_s7, %s2128_s15  ;;  %p2133_p2 = scmp.lt.s32.totalorder %s2785_s7, %s2831_s5 }
 0x238   : > { %p2134_p4 = scmp.lt.s32.totalorder %s2132_s29, %s2128_s15 }
 0x239   : > { %p2130_p3 = pnand %p2129_p11, %p2866_p6 }
 0x23a   : > { %p2135_p8 = por %p2134_p4, %p2133_p2 }
 0x23b   : > { %p2131_p1 = pneg %p2130_p3 }
 0x23d   : > { %p2136_p13 = pnand %p2135_p8, %p2131_p1 }
 0x23f   : > { %2139 = shalt.err (!%p2136_p13)
}
 0x240   : > { %1923 = dma.vmem_to_hbm [thread:$0]  (%p2866_p6), %s1654_s3, 192, %s2785_s7, %s1639_s22  }
 0x241 PF: > { %s1665_s28 = sand.u32 1, %s2178_s18   ;;  %p2867_p9 = scmp.ne.s32.totalorder %s2844_s25, 0 }
 0x242   : > { %p2868_p10 = scmp.ge.s32.totalorder %s2190_s21, 2  ;;  %s1666_s30 = scalar_lea.sflag [#allocation4], %s1665_s28 }
 0x244   : > { %p1943_p12 = pnand %p2868_p10, %p2867_p9 }
 0x246   : > { %p1944_p5 = pneg %p1943_p12 }
 0x248   : > { %2173 = dma.done.wait (%p1944_p5), %s1666_s30, 192  }
 0x249   : > { %2175 = vsyncadd (%p1944_p5), %s1666_s30, 4294967104  ;;  %s2869_s13 = sld [smem:[#allocation18_spill]]  ;;  %p21_p0 = scmp.ge.s32.totalorder %s2346_s9, 4  }
 0x24a   : > { %s2870_s20 = sld [smem:[#allocation19_spill]]  ;;  %s2871_s18 = smov %s2182_s19 }
 0x24b   : > { %s2873_s21 = smov %s2346_s9  ;;  %23 = sbr.rel (!%p21_p0) target bundleno = 14 (0xe), region = 113 }
 0x24f   : > { %s2872_s19 = smov %s2869_s13 }
 0x250   :  { %1671 = vsyncpa [#allocation3], 1 }
 0x251   :  { %1673 = vsyncpa [#allocation3 + $0x1], 1 }
 0x252   :  { %1674 = vsyncpa [#allocation7], 1 }
 0x253   :  { %1675 = vsyncpa [#allocation4], 1 }
 0x254   :  { %1677 = vsyncpa [#allocation4 + $0x1], 1 }
 0x255   :  { %1678 = vsyncpa [#allocation5], 1 }
 0x256   :  { %1680 = vsyncpa [#allocation5 + $0x1], 1 }
 0x257   :  { %1681 = vsyncpa [#allocation10], 1 }

</bundles_post_ra>
